<compile_context>
chip_gen: v7x
topology: tpu7x:2x2x1
jax: 0.10.0
libtpu: 0.0.40
codegen_flags: <defaults>
</compile_context>

<pallas_src>
import numpy as np

import jax
import jax.numpy as jnp
from jax.experimental import pallas as pl
from jax.experimental.pallas import tpu as pltpu  # noqa: F401  (kept for TODOs above)


# ----------------------------------------------------------------------------
# Geometry: per-tap (S_in, S_out) 0/1 matrices that fuse nearest-2x upsample,
# zero padding and the (ki, kj) shift of a 3x3 "same" conv, in flattened
# row-major (y*W + x) coordinates.  Built with numpy at trace time (constants).
# ----------------------------------------------------------------------------
def _nearest_up_conv_tap_matrices(h, w):
    hu, wu = 2 * h, 2 * w
    s_in, s_out = h * w, hu * wu
    m = np.zeros((9, s_in, s_out), np.float32)
    for ki in range(3):
        for kj in range(3):
            k = 3 * ki + kj
            for t in range(s_out):
                y, x = divmod(t, wu)
                yu, xu = y + ki - 1, x + kj - 1        # tap position (pad=1)
                if 0 <= yu < hu and 0 <= xu < wu:      # else: zero padding
                    s = (yu // 2) * w + (xu // 2)      # nearest-2x source pixel
                    m[k, s, t] = 1.0
    return m


# ----------------------------------------------------------------------------
# Fused decoder kernel: the whole up-layer chain, all batch elements, one call.
# refs = (x, [w_bd, bias, M] * num_layers, out)
#   x    : (B*C0, S0)            f32
#   w_bd : (9, B*Cout, B*Cin)    bf16  (block-diagonal over batch, per tap)
#   bias : (B*Cout, 1)           f32
#   M    : (9, S_in, S_out)      bf16  (0/1 upsample+pad+shift selection)
#   out  : (B*Cout_last, S_last) f32
# ----------------------------------------------------------------------------
def _make_decoder_kernel(num_layers):
    def kernel(*refs):
        x_ref = refs[0]
        layer_refs = refs[1:1 + 3 * num_layers]
        o_ref = refs[1 + 3 * num_layers]

        cur = x_ref[...]                                    # (B*C0, S0) f32
        for l in range(num_layers):
            w_ref = layer_refs[3 * l]                       # (9, BCo, BCi) bf16
            b_ref = layer_refs[3 * l + 1]                   # (BCo, 1)      f32
            m_ref = layer_refs[3 * l + 2]                   # (9, Sin, Sout) bf16
            rows_out = w_ref.shape[1]
            s_out = m_ref.shape[2]

            xb = cur.astype(jnp.bfloat16)                   # one cast per layer
            acc = jnp.broadcast_to(b_ref[...], (rows_out, s_out))  # bias-init acc
            for k in range(9):                              # 9 taps, 2 dots each
                # Upsample + pad + shift: pure 0/1 selection -> exact in bf16.
                z = jnp.dot(xb, m_ref[k], preferred_element_type=jnp.float32)
                acc = acc + jnp.dot(w_ref[k], z.astype(jnp.bfloat16),
                                    preferred_element_type=jnp.float32)
            cur = jnp.maximum(acc, 0.0)                     # ReLU, f32
        o_ref[...] = cur                                    # lane-dense store
    return kernel


# ----------------------------------------------------------------------------
# Wrapper: contiguous reshapes only (no transposes), builds per-layer constants
# and calls the single grid-less pallas_call.
# ----------------------------------------------------------------------------
def decoder_forward(embedding_nchw, params, *, img_size):
    """embedding_nchw: (B, C, H, W) f32; params: tuple of (w (3,3,Cin,Cout), b (Cout,))."""
    B, C, H, W = embedding_nchw.shape
    num_layers = len(params)

    x2d = embedding_nchw.reshape(B * C, H * W).astype(jnp.float32)  # contiguous

    args = [x2d]
    h, w, c = H, W, C
    eye_b = jnp.eye(B, dtype=jnp.float32)
    for wgt, bias in params:
        kh, kw, cin, cout = wgt.shape
        assert (kh, kw) == (3, 3) and cin == c
        # Per-tap (Cout, Cin) weights, block-diagonal over batch -> (9, B*Cout, B*Cin).
        w_t = jnp.transpose(wgt, (0, 1, 3, 2)).reshape(9, cout, cin)
        w_bd = jnp.einsum("ab,koi->kaobi", eye_b, w_t).reshape(9, B * cout, B * cin)
        b_bd = jnp.tile(bias.astype(jnp.float32), B).reshape(B * cout, 1)
        m = jnp.asarray(_nearest_up_conv_tap_matrices(h, w), dtype=jnp.bfloat16)
        args += [w_bd.astype(jnp.bfloat16), b_bd, m]
        h, w, c = 2 * h, 2 * w, cout

    y2d = pl.pallas_call(
        _make_decoder_kernel(num_layers),
        out_shape=jax.ShapeDtypeStruct((B * c, h * w), jnp.float32),
    )(*args)

    y = y2d.reshape(B, c, h, w)                              # contiguous
    if (h, w) != (img_size, img_size):
        # Reference appends nn.Upsample(size=img_size, mode='bilinear') when the
        # 2x chain doesn't land exactly on img_size.
        # TODO(synk): wrapper-side XLA bilinear resize, not a Pallas kernel.
        y = jax.image.resize(y, (B, c, img_size, img_size), method="bilinear")
    return y


decoder_apply = jax.jit(decoder_forward, static_argnames=("img_size",))


# ----------------------------------------------------------------------------
# Parameter construction (matches the reference hidden_sizes schedule).
# ----------------------------------------------------------------------------
def make_decoder_params(key, in_channels, out_channels, num_scaling_layers):
    hidden = ([in_channels]
              + [int(in_channels // 2 ** i) for i in range(1, num_scaling_layers)]
              + [out_channels])
    params = []
    for i in range(len(hidden) - 1):
        cin, cout = hidden[i], hidden[i + 1]
        key, kw, kb = jax.random.split(key, 3)
        fan_in = cin * 9
        w = jax.random.normal(kw, (3, 3, cin, cout), jnp.float32) / jnp.sqrt(fan_in)
        b = 0.01 * jax.random.normal(kb, (cout,), jnp.float32)
        params.append((w, b))
    return tuple(params)


# Pure-JAX (f32) reference of the assumed UpLayer stack, for a correctness check.
def reference_forward(x_nchw, params):
    x = x_nchw
    for wgt, bias in params:
        x = jnp.repeat(jnp.repeat(x, 2, axis=2), 2, axis=3)   # nearest 2x, NCHW
        x = jax.lax.conv_general_dilated(
            x, wgt, window_strides=(1, 1), padding=((1, 1), (1, 1)),
            dimension_numbers=("NCHW", "HWIO", "NCHW"))
        x = jax.nn.relu(x + bias.reshape(1, -1, 1, 1))
    return x


if __name__ == "__main__":
    # Small config: img_size=16, in_channels=16, out_channels=3,
    # num_scaling_layers=3, input spatial dims = 2 (2 * 2**3 == 16, so the
    # reference module does NOT append the bilinear Upsample branch).
    B = 2
    in_channels = 16
    out_channels = 3
    num_scaling_layers = 3
    input_dims = 2
    img_size = 16

    key = jax.random.PRNGKey(0)
    key, k_emb = jax.random.split(key)
    embedding = jax.random.normal(
        k_emb, (B, in_channels, input_dims, input_dims), jnp.float32)
    params = make_decoder_params(key, in_channels, out_channels, num_scaling_layers)

    out = decoder_apply(embedding, params, img_size=img_size)
    out = jax.block_until_ready(out)

    assert out.shape == (B, out_channels, img_size, img_size), out.shape
    assert bool(jnp.all(jnp.isfinite(out)))

    ref = reference_forward(embedding, params)
    max_err = float(jnp.max(jnp.abs(out - ref)))
    assert max_err < 5e-2, f"max abs err vs f32 reference: {max_err}"

    print("KERNEL_OK")
</pallas_src>

<mosaic_0001>
module attributes {stable_mosaic.version = 11 : i64} {
  func.func @kernel(%arg0: memref<32x4xf32, #tpu.memory_space<vmem>>, %arg1: memref<9x16x32xbf16, #tpu.memory_space<vmem>>, %arg2: memref<16x1xf32, #tpu.memory_space<vmem>>, %arg3: memref<9x4x16xbf16, #tpu.memory_space<vmem>>, %arg4: memref<9x8x16xbf16, #tpu.memory_space<vmem>>, %arg5: memref<8x1xf32, #tpu.memory_space<vmem>>, %arg6: memref<9x16x64xbf16, #tpu.memory_space<vmem>>, %arg7: memref<9x6x8xbf16, #tpu.memory_space<vmem>>, %arg8: memref<6x1xf32, #tpu.memory_space<vmem>>, %arg9: memref<9x64x256xbf16, #tpu.memory_space<vmem>>, %arg10: memref<6x256xf32, #tpu.memory_space<vmem>>) attributes {dimension_semantics = [], scalar_prefetch = 0 : i64, scratch_operands = 0 : i64, tpu.core_type = #tpu.core_type<tc>} {
    %c0 = arith.constant 0 : index
    %c0_0 = arith.constant 0 : index
    %0 = vector.load %arg0[%c0, %c0_0] : memref<32x4xf32, #tpu.memory_space<vmem>>, vector<32x4xf32>
    %1 = arith.truncf %0 : vector<32x4xf32> to vector<32x4xbf16>
    %c0_1 = arith.constant 0 : index
    %c0_2 = arith.constant 0 : index
    %2 = vector.load %arg2[%c0_1, %c0_2] : memref<16x1xf32, #tpu.memory_space<vmem>>, vector<16x1xf32>
    %3 = vector.shape_cast %2 : vector<16x1xf32> to vector<16x1xf32>
    %4 = vector.broadcast %3 : vector<16x1xf32> to vector<16x16xf32>
    %c0_3 = arith.constant 0 : index
    %c0_4 = arith.constant 0 : index
    %c0_5 = arith.constant 0 : index
    %5 = vector.load %arg3[%c0_3, %c0_4, %c0_5] : memref<9x4x16xbf16, #tpu.memory_space<vmem>>, vector<1x4x16xbf16>
    %6 = vector.shape_cast %5 : vector<1x4x16xbf16> to vector<4x16xbf16>
    %cst = arith.constant dense<0.000000e+00> : vector<32x16xf32>
    %7 = tpu.matmul %1, %6, %cst {dimension_numbers = #tpu.dot_dimension_numbers<[1], [0], [0], [1], [0, 0, 1, 1], [], []>} : vector<32x4xbf16>, vector<4x16xbf16>, vector<32x16xf32> -> vector<32x16xf32>
    %c0_6 = arith.constant 0 : index
    %c0_7 = arith.constant 0 : index
    %c0_8 = arith.constant 0 : index
    %8 = vector.load %arg1[%c0_6, %c0_7, %c0_8] : memref<9x16x32xbf16, #tpu.memory_space<vmem>>, vector<1x16x32xbf16>
    %9 = vector.shape_cast %8 : vector<1x16x32xbf16> to vector<16x32xbf16>
    %10 = arith.truncf %7 : vector<32x16xf32> to vector<32x16xbf16>
    %cst_9 = arith.constant dense<0.000000e+00> : vector<16x16xf32>
    %11 = tpu.matmul %9, %10, %cst_9 {dimension_numbers = #tpu.dot_dimension_numbers<[1], [0], [0], [1], [0, 0, 1, 1], [], []>} : vector<16x32xbf16>, vector<32x16xbf16>, vector<16x16xf32> -> vector<16x16xf32>
    %12 = arith.addf %4, %11 : vector<16x16xf32>
    %c1 = arith.constant 1 : index
    %c0_10 = arith.constant 0 : index
    %c0_11 = arith.constant 0 : index
    %13 = vector.load %arg3[%c1, %c0_10, %c0_11] : memref<9x4x16xbf16, #tpu.memory_space<vmem>>, vector<1x4x16xbf16>
    %14 = vector.shape_cast %13 : vector<1x4x16xbf16> to vector<4x16xbf16>
    %cst_12 = arith.constant dense<0.000000e+00> : vector<32x16xf32>
    %15 = tpu.matmul %1, %14, %cst_12 {dimension_numbers = #tpu.dot_dimension_numbers<[1], [0], [0], [1], [0, 0, 1, 1], [], []>} : vector<32x4xbf16>, vector<4x16xbf16>, vector<32x16xf32> -> vector<32x16xf32>
    %c1_13 = arith.constant 1 : index
    %c0_14 = arith.constant 0 : index
    %c0_15 = arith.constant 0 : index
    %16 = vector.load %arg1[%c1_13, %c0_14, %c0_15] : memref<9x16x32xbf16, #tpu.memory_space<vmem>>, vector<1x16x32xbf16>
    %17 = vector.shape_cast %16 : vector<1x16x32xbf16> to vector<16x32xbf16>
    %18 = arith.truncf %15 : vector<32x16xf32> to vector<32x16xbf16>
    %cst_16 = arith.constant dense<0.000000e+00> : vector<16x16xf32>
    %19 = tpu.matmul %17, %18, %cst_16 {dimension_numbers = #tpu.dot_dimension_numbers<[1], [0], [0], [1], [0, 0, 1, 1], [], []>} : vector<16x32xbf16>, vector<32x16xbf16>, vector<16x16xf32> -> vector<16x16xf32>
    %20 = arith.addf %12, %19 : vector<16x16xf32>
    %c2 = arith.constant 2 : index
    %c0_17 = arith.constant 0 : index
    %c0_18 = arith.constant 0 : index
    %21 = vector.load %arg3[%c2, %c0_17, %c0_18] : memref<9x4x16xbf16, #tpu.memory_space<vmem>>, vector<1x4x16xbf16>
    %22 = vector.shape_cast %21 : vector<1x4x16xbf16> to vector<4x16xbf16>
    %cst_19 = arith.constant dense<0.000000e+00> : vector<32x16xf32>
    %23 = tpu.matmul %1, %22, %cst_19 {dimension_numbers = #tpu.dot_dimension_numbers<[1], [0], [0], [1], [0, 0, 1, 1], [], []>} : vector<32x4xbf16>, vector<4x16xbf16>, vector<32x16xf32> -> vector<32x16xf32>
    %c2_20 = arith.constant 2 : index
    %c0_21 = arith.constant 0 : index
    %c0_22 = arith.constant 0 : index
    %24 = vector.load %arg1[%c2_20, %c0_21, %c0_22] : memref<9x16x32xbf16, #tpu.memory_space<vmem>>, vector<1x16x32xbf16>
    %25 = vector.shape_cast %24 : vector<1x16x32xbf16> to vector<16x32xbf16>
    %26 = arith.truncf %23 : vector<32x16xf32> to vector<32x16xbf16>
    %cst_23 = arith.constant dense<0.000000e+00> : vector<16x16xf32>
    %27 = tpu.matmul %25, %26, %cst_23 {dimension_numbers = #tpu.dot_dimension_numbers<[1], [0], [0], [1], [0, 0, 1, 1], [], []>} : vector<16x32xbf16>, vector<32x16xbf16>, vector<16x16xf32> -> vector<16x16xf32>
    %28 = arith.addf %20, %27 : vector<16x16xf32>
    %c3 = arith.constant 3 : index
    %c0_24 = arith.constant 0 : index
    %c0_25 = arith.constant 0 : index
    %29 = vector.load %arg3[%c3, %c0_24, %c0_25] : memref<9x4x16xbf16, #tpu.memory_space<vmem>>, vector<1x4x16xbf16>
    %30 = vector.shape_cast %29 : vector<1x4x16xbf16> to vector<4x16xbf16>
    %cst_26 = arith.constant dense<0.000000e+00> : vector<32x16xf32>
    %31 = tpu.matmul %1, %30, %cst_26 {dimension_numbers = #tpu.dot_dimension_numbers<[1], [0], [0], [1], [0, 0, 1, 1], [], []>} : vector<32x4xbf16>, vector<4x16xbf16>, vector<32x16xf32> -> vector<32x16xf32>
    %c3_27 = arith.constant 3 : index
    %c0_28 = arith.constant 0 : index
    %c0_29 = arith.constant 0 : index
    %32 = vector.load %arg1[%c3_27, %c0_28, %c0_29] : memref<9x16x32xbf16, #tpu.memory_space<vmem>>, vector<1x16x32xbf16>
    %33 = vector.shape_cast %32 : vector<1x16x32xbf16> to vector<16x32xbf16>
    %34 = arith.truncf %31 : vector<32x16xf32> to vector<32x16xbf16>
    %cst_30 = arith.constant dense<0.000000e+00> : vector<16x16xf32>
    %35 = tpu.matmul %33, %34, %cst_30 {dimension_numbers = #tpu.dot_dimension_numbers<[1], [0], [0], [1], [0, 0, 1, 1], [], []>} : vector<16x32xbf16>, vector<32x16xbf16>, vector<16x16xf32> -> vector<16x16xf32>
    %36 = arith.addf %28, %35 : vector<16x16xf32>
    %c4 = arith.constant 4 : index
    %c0_31 = arith.constant 0 : index
    %c0_32 = arith.constant 0 : index
    %37 = vector.load %arg3[%c4, %c0_31, %c0_32] : memref<9x4x16xbf16, #tpu.memory_space<vmem>>, vector<1x4x16xbf16>
    %38 = vector.shape_cast %37 : vector<1x4x16xbf16> to vector<4x16xbf16>
    %cst_33 = arith.constant dense<0.000000e+00> : vector<32x16xf32>
    %39 = tpu.matmul %1, %38, %cst_33 {dimension_numbers = #tpu.dot_dimension_numbers<[1], [0], [0], [1], [0, 0, 1, 1], [], []>} : vector<32x4xbf16>, vector<4x16xbf16>, vector<32x16xf32> -> vector<32x16xf32>
    %c4_34 = arith.constant 4 : index
    %c0_35 = arith.constant 0 : index
    %c0_36 = arith.constant 0 : index
    %40 = vector.load %arg1[%c4_34, %c0_35, %c0_36] : memref<9x16x32xbf16, #tpu.memory_space<vmem>>, vector<1x16x32xbf16>
    %41 = vector.shape_cast %40 : vector<1x16x32xbf16> to vector<16x32xbf16>
    %42 = arith.truncf %39 : vector<32x16xf32> to vector<32x16xbf16>
    %cst_37 = arith.constant dense<0.000000e+00> : vector<16x16xf32>
    %43 = tpu.matmul %41, %42, %cst_37 {dimension_numbers = #tpu.dot_dimension_numbers<[1], [0], [0], [1], [0, 0, 1, 1], [], []>} : vector<16x32xbf16>, vector<32x16xbf16>, vector<16x16xf32> -> vector<16x16xf32>
    %44 = arith.addf %36, %43 : vector<16x16xf32>
    %c5 = arith.constant 5 : index
    %c0_38 = arith.constant 0 : index
    %c0_39 = arith.constant 0 : index
    %45 = vector.load %arg3[%c5, %c0_38, %c0_39] : memref<9x4x16xbf16, #tpu.memory_space<vmem>>, vector<1x4x16xbf16>
    %46 = vector.shape_cast %45 : vector<1x4x16xbf16> to vector<4x16xbf16>
    %cst_40 = arith.constant dense<0.000000e+00> : vector<32x16xf32>
    %47 = tpu.matmul %1, %46, %cst_40 {dimension_numbers = #tpu.dot_dimension_numbers<[1], [0], [0], [1], [0, 0, 1, 1], [], []>} : vector<32x4xbf16>, vector<4x16xbf16>, vector<32x16xf32> -> vector<32x16xf32>
    %c5_41 = arith.constant 5 : index
    %c0_42 = arith.constant 0 : index
    %c0_43 = arith.constant 0 : index
    %48 = vector.load %arg1[%c5_41, %c0_42, %c0_43] : memref<9x16x32xbf16, #tpu.memory_space<vmem>>, vector<1x16x32xbf16>
    %49 = vector.shape_cast %48 : vector<1x16x32xbf16> to vector<16x32xbf16>
    %50 = arith.truncf %47 : vector<32x16xf32> to vector<32x16xbf16>
    %cst_44 = arith.constant dense<0.000000e+00> : vector<16x16xf32>
    %51 = tpu.matmul %49, %50, %cst_44 {dimension_numbers = #tpu.dot_dimension_numbers<[1], [0], [0], [1], [0, 0, 1, 1], [], []>} : vector<16x32xbf16>, vector<32x16xbf16>, vector<16x16xf32> -> vector<16x16xf32>
    %52 = arith.addf %44, %51 : vector<16x16xf32>
    %c6 = arith.constant 6 : index
    %c0_45 = arith.constant 0 : index
    %c0_46 = arith.constant 0 : index
    %53 = vector.load %arg3[%c6, %c0_45, %c0_46] : memref<9x4x16xbf16, #tpu.memory_space<vmem>>, vector<1x4x16xbf16>
    %54 = vector.shape_cast %53 : vector<1x4x16xbf16> to vector<4x16xbf16>
    %cst_47 = arith.constant dense<0.000000e+00> : vector<32x16xf32>
    %55 = tpu.matmul %1, %54, %cst_47 {dimension_numbers = #tpu.dot_dimension_numbers<[1], [0], [0], [1], [0, 0, 1, 1], [], []>} : vector<32x4xbf16>, vector<4x16xbf16>, vector<32x16xf32> -> vector<32x16xf32>
    %c6_48 = arith.constant 6 : index
    %c0_49 = arith.constant 0 : index
    %c0_50 = arith.constant 0 : index
    %56 = vector.load %arg1[%c6_48, %c0_49, %c0_50] : memref<9x16x32xbf16, #tpu.memory_space<vmem>>, vector<1x16x32xbf16>
    %57 = vector.shape_cast %56 : vector<1x16x32xbf16> to vector<16x32xbf16>
    %58 = arith.truncf %55 : vector<32x16xf32> to vector<32x16xbf16>
    %cst_51 = arith.constant dense<0.000000e+00> : vector<16x16xf32>
    %59 = tpu.matmul %57, %58, %cst_51 {dimension_numbers = #tpu.dot_dimension_numbers<[1], [0], [0], [1], [0, 0, 1, 1], [], []>} : vector<16x32xbf16>, vector<32x16xbf16>, vector<16x16xf32> -> vector<16x16xf32>
    %60 = arith.addf %52, %59 : vector<16x16xf32>
    %c7 = arith.constant 7 : index
    %c0_52 = arith.constant 0 : index
    %c0_53 = arith.constant 0 : index
    %61 = vector.load %arg3[%c7, %c0_52, %c0_53] : memref<9x4x16xbf16, #tpu.memory_space<vmem>>, vector<1x4x16xbf16>
    %62 = vector.shape_cast %61 : vector<1x4x16xbf16> to vector<4x16xbf16>
    %cst_54 = arith.constant dense<0.000000e+00> : vector<32x16xf32>
    %63 = tpu.matmul %1, %62, %cst_54 {dimension_numbers = #tpu.dot_dimension_numbers<[1], [0], [0], [1], [0, 0, 1, 1], [], []>} : vector<32x4xbf16>, vector<4x16xbf16>, vector<32x16xf32> -> vector<32x16xf32>
    %c7_55 = arith.constant 7 : index
    %c0_56 = arith.constant 0 : index
    %c0_57 = arith.constant 0 : index
    %64 = vector.load %arg1[%c7_55, %c0_56, %c0_57] : memref<9x16x32xbf16, #tpu.memory_space<vmem>>, vector<1x16x32xbf16>
    %65 = vector.shape_cast %64 : vector<1x16x32xbf16> to vector<16x32xbf16>
    %66 = arith.truncf %63 : vector<32x16xf32> to vector<32x16xbf16>
    %cst_58 = arith.constant dense<0.000000e+00> : vector<16x16xf32>
    %67 = tpu.matmul %65, %66, %cst_58 {dimension_numbers = #tpu.dot_dimension_numbers<[1], [0], [0], [1], [0, 0, 1, 1], [], []>} : vector<16x32xbf16>, vector<32x16xbf16>, vector<16x16xf32> -> vector<16x16xf32>
    %68 = arith.addf %60, %67 : vector<16x16xf32>
    %c8 = arith.constant 8 : index
    %c0_59 = arith.constant 0 : index
    %c0_60 = arith.constant 0 : index
    %69 = vector.load %arg3[%c8, %c0_59, %c0_60] : memref<9x4x16xbf16, #tpu.memory_space<vmem>>, vector<1x4x16xbf16>
    %70 = vector.shape_cast %69 : vector<1x4x16xbf16> to vector<4x16xbf16>
    %cst_61 = arith.constant dense<0.000000e+00> : vector<32x16xf32>
    %71 = tpu.matmul %1, %70, %cst_61 {dimension_numbers = #tpu.dot_dimension_numbers<[1], [0], [0], [1], [0, 0, 1, 1], [], []>} : vector<32x4xbf16>, vector<4x16xbf16>, vector<32x16xf32> -> vector<32x16xf32>
    %c8_62 = arith.constant 8 : index
    %c0_63 = arith.constant 0 : index
    %c0_64 = arith.constant 0 : index
    %72 = vector.load %arg1[%c8_62, %c0_63, %c0_64] : memref<9x16x32xbf16, #tpu.memory_space<vmem>>, vector<1x16x32xbf16>
    %73 = vector.shape_cast %72 : vector<1x16x32xbf16> to vector<16x32xbf16>
    %74 = arith.truncf %71 : vector<32x16xf32> to vector<32x16xbf16>
    %cst_65 = arith.constant dense<0.000000e+00> : vector<16x16xf32>
    %75 = tpu.matmul %73, %74, %cst_65 {dimension_numbers = #tpu.dot_dimension_numbers<[1], [0], [0], [1], [0, 0, 1, 1], [], []>} : vector<16x32xbf16>, vector<32x16xbf16>, vector<16x16xf32> -> vector<16x16xf32>
    %76 = arith.addf %68, %75 : vector<16x16xf32>
    %cst_66 = arith.constant 0.000000e+00 : f32
    %77 = vector.broadcast %cst_66 : f32 to vector<16x16xf32>
    %78 = arith.maximumf %76, %77 : vector<16x16xf32>
    %79 = arith.truncf %78 : vector<16x16xf32> to vector<16x16xbf16>
    %c0_67 = arith.constant 0 : index
    %c0_68 = arith.constant 0 : index
    %80 = vector.load %arg5[%c0_67, %c0_68] : memref<8x1xf32, #tpu.memory_space<vmem>>, vector<8x1xf32>
    %81 = vector.shape_cast %80 : vector<8x1xf32> to vector<8x1xf32>
    %82 = vector.broadcast %81 : vector<8x1xf32> to vector<8x64xf32>
    %c0_69 = arith.constant 0 : index
    %c0_70 = arith.constant 0 : index
    %c0_71 = arith.constant 0 : index
    %83 = vector.load %arg6[%c0_69, %c0_70, %c0_71] : memref<9x16x64xbf16, #tpu.memory_space<vmem>>, vector<1x16x64xbf16>
    %84 = vector.shape_cast %83 : vector<1x16x64xbf16> to vector<16x64xbf16>
    %cst_72 = arith.constant dense<0.000000e+00> : vector<16x64xf32>
    %85 = tpu.matmul %79, %84, %cst_72 {dimension_numbers = #tpu.dot_dimension_numbers<[1], [0], [0], [1], [0, 0, 1, 1], [], []>} : vector<16x16xbf16>, vector<16x64xbf16>, vector<16x64xf32> -> vector<16x64xf32>
    %c0_73 = arith.constant 0 : index
    %c0_74 = arith.constant 0 : index
    %c0_75 = arith.constant 0 : index
    %86 = vector.load %arg4[%c0_73, %c0_74, %c0_75] : memref<9x8x16xbf16, #tpu.memory_space<vmem>>, vector<1x8x16xbf16>
    %87 = vector.shape_cast %86 : vector<1x8x16xbf16> to vector<8x16xbf16>
    %88 = arith.truncf %85 : vector<16x64xf32> to vector<16x64xbf16>
    %cst_76 = arith.constant dense<0.000000e+00> : vector<8x64xf32>
    %89 = tpu.matmul %87, %88, %cst_76 {dimension_numbers = #tpu.dot_dimension_numbers<[1], [0], [0], [1], [0, 0, 1, 1], [], []>} : vector<8x16xbf16>, vector<16x64xbf16>, vector<8x64xf32> -> vector<8x64xf32>
    %90 = arith.addf %82, %89 : vector<8x64xf32>
    %c1_77 = arith.constant 1 : index
    %c0_78 = arith.constant 0 : index
    %c0_79 = arith.constant 0 : index
    %91 = vector.load %arg6[%c1_77, %c0_78, %c0_79] : memref<9x16x64xbf16, #tpu.memory_space<vmem>>, vector<1x16x64xbf16>
    %92 = vector.shape_cast %91 : vector<1x16x64xbf16> to vector<16x64xbf16>
    %cst_80 = arith.constant dense<0.000000e+00> : vector<16x64xf32>
    %93 = tpu.matmul %79, %92, %cst_80 {dimension_numbers = #tpu.dot_dimension_numbers<[1], [0], [0], [1], [0, 0, 1, 1], [], []>} : vector<16x16xbf16>, vector<16x64xbf16>, vector<16x64xf32> -> vector<16x64xf32>
    %c1_81 = arith.constant 1 : index
    %c0_82 = arith.constant 0 : index
    %c0_83 = arith.constant 0 : index
    %94 = vector.load %arg4[%c1_81, %c0_82, %c0_83] : memref<9x8x16xbf16, #tpu.memory_space<vmem>>, vector<1x8x16xbf16>
    %95 = vector.shape_cast %94 : vector<1x8x16xbf16> to vector<8x16xbf16>
    %96 = arith.truncf %93 : vector<16x64xf32> to vector<16x64xbf16>
    %cst_84 = arith.constant dense<0.000000e+00> : vector<8x64xf32>
    %97 = tpu.matmul %95, %96, %cst_84 {dimension_numbers = #tpu.dot_dimension_numbers<[1], [0], [0], [1], [0, 0, 1, 1], [], []>} : vector<8x16xbf16>, vector<16x64xbf16>, vector<8x64xf32> -> vector<8x64xf32>
    %98 = arith.addf %90, %97 : vector<8x64xf32>
    %c2_85 = arith.constant 2 : index
    %c0_86 = arith.constant 0 : index
    %c0_87 = arith.constant 0 : index
    %99 = vector.load %arg6[%c2_85, %c0_86, %c0_87] : memref<9x16x64xbf16, #tpu.memory_space<vmem>>, vector<1x16x64xbf16>
    %100 = vector.shape_cast %99 : vector<1x16x64xbf16> to vector<16x64xbf16>
    %cst_88 = arith.constant dense<0.000000e+00> : vector<16x64xf32>
    %101 = tpu.matmul %79, %100, %cst_88 {dimension_numbers = #tpu.dot_dimension_numbers<[1], [0], [0], [1], [0, 0, 1, 1], [], []>} : vector<16x16xbf16>, vector<16x64xbf16>, vector<16x64xf32> -> vector<16x64xf32>
    %c2_89 = arith.constant 2 : index
    %c0_90 = arith.constant 0 : index
    %c0_91 = arith.constant 0 : index
    %102 = vector.load %arg4[%c2_89, %c0_90, %c0_91] : memref<9x8x16xbf16, #tpu.memory_space<vmem>>, vector<1x8x16xbf16>
    %103 = vector.shape_cast %102 : vector<1x8x16xbf16> to vector<8x16xbf16>
    %104 = arith.truncf %101 : vector<16x64xf32> to vector<16x64xbf16>
    %cst_92 = arith.constant dense<0.000000e+00> : vector<8x64xf32>
    %105 = tpu.matmul %103, %104, %cst_92 {dimension_numbers = #tpu.dot_dimension_numbers<[1], [0], [0], [1], [0, 0, 1, 1], [], []>} : vector<8x16xbf16>, vector<16x64xbf16>, vector<8x64xf32> -> vector<8x64xf32>
    %106 = arith.addf %98, %105 : vector<8x64xf32>
    %c3_93 = arith.constant 3 : index
    %c0_94 = arith.constant 0 : index
    %c0_95 = arith.constant 0 : index
    %107 = vector.load %arg6[%c3_93, %c0_94, %c0_95] : memref<9x16x64xbf16, #tpu.memory_space<vmem>>, vector<1x16x64xbf16>
    %108 = vector.shape_cast %107 : vector<1x16x64xbf16> to vector<16x64xbf16>
    %cst_96 = arith.constant dense<0.000000e+00> : vector<16x64xf32>
    %109 = tpu.matmul %79, %108, %cst_96 {dimension_numbers = #tpu.dot_dimension_numbers<[1], [0], [0], [1], [0, 0, 1, 1], [], []>} : vector<16x16xbf16>, vector<16x64xbf16>, vector<16x64xf32> -> vector<16x64xf32>
    %c3_97 = arith.constant 3 : index
    %c0_98 = arith.constant 0 : index
    %c0_99 = arith.constant 0 : index
    %110 = vector.load %arg4[%c3_97, %c0_98, %c0_99] : memref<9x8x16xbf16, #tpu.memory_space<vmem>>, vector<1x8x16xbf16>
    %111 = vector.shape_cast %110 : vector<1x8x16xbf16> to vector<8x16xbf16>
    %112 = arith.truncf %109 : vector<16x64xf32> to vector<16x64xbf16>
    %cst_100 = arith.constant dense<0.000000e+00> : vector<8x64xf32>
    %113 = tpu.matmul %111, %112, %cst_100 {dimension_numbers = #tpu.dot_dimension_numbers<[1], [0], [0], [1], [0, 0, 1, 1], [], []>} : vector<8x16xbf16>, vector<16x64xbf16>, vector<8x64xf32> -> vector<8x64xf32>
    %114 = arith.addf %106, %113 : vector<8x64xf32>
    %c4_101 = arith.constant 4 : index
    %c0_102 = arith.constant 0 : index
    %c0_103 = arith.constant 0 : index
    %115 = vector.load %arg6[%c4_101, %c0_102, %c0_103] : memref<9x16x64xbf16, #tpu.memory_space<vmem>>, vector<1x16x64xbf16>
    %116 = vector.shape_cast %115 : vector<1x16x64xbf16> to vector<16x64xbf16>
    %cst_104 = arith.constant dense<0.000000e+00> : vector<16x64xf32>
    %117 = tpu.matmul %79, %116, %cst_104 {dimension_numbers = #tpu.dot_dimension_numbers<[1], [0], [0], [1], [0, 0, 1, 1], [], []>} : vector<16x16xbf16>, vector<16x64xbf16>, vector<16x64xf32> -> vector<16x64xf32>
    %c4_105 = arith.constant 4 : index
    %c0_106 = arith.constant 0 : index
    %c0_107 = arith.constant 0 : index
    %118 = vector.load %arg4[%c4_105, %c0_106, %c0_107] : memref<9x8x16xbf16, #tpu.memory_space<vmem>>, vector<1x8x16xbf16>
    %119 = vector.shape_cast %118 : vector<1x8x16xbf16> to vector<8x16xbf16>
    %120 = arith.truncf %117 : vector<16x64xf32> to vector<16x64xbf16>
    %cst_108 = arith.constant dense<0.000000e+00> : vector<8x64xf32>
    %121 = tpu.matmul %119, %120, %cst_108 {dimension_numbers = #tpu.dot_dimension_numbers<[1], [0], [0], [1], [0, 0, 1, 1], [], []>} : vector<8x16xbf16>, vector<16x64xbf16>, vector<8x64xf32> -> vector<8x64xf32>
    %122 = arith.addf %114, %121 : vector<8x64xf32>
    %c5_109 = arith.constant 5 : index
    %c0_110 = arith.constant 0 : index
    %c0_111 = arith.constant 0 : index
    %123 = vector.load %arg6[%c5_109, %c0_110, %c0_111] : memref<9x16x64xbf16, #tpu.memory_space<vmem>>, vector<1x16x64xbf16>
    %124 = vector.shape_cast %123 : vector<1x16x64xbf16> to vector<16x64xbf16>
    %cst_112 = arith.constant dense<0.000000e+00> : vector<16x64xf32>
    %125 = tpu.matmul %79, %124, %cst_112 {dimension_numbers = #tpu.dot_dimension_numbers<[1], [0], [0], [1], [0, 0, 1, 1], [], []>} : vector<16x16xbf16>, vector<16x64xbf16>, vector<16x64xf32> -> vector<16x64xf32>
    %c5_113 = arith.constant 5 : index
    %c0_114 = arith.constant 0 : index
    %c0_115 = arith.constant 0 : index
    %126 = vector.load %arg4[%c5_113, %c0_114, %c0_115] : memref<9x8x16xbf16, #tpu.memory_space<vmem>>, vector<1x8x16xbf16>
    %127 = vector.shape_cast %126 : vector<1x8x16xbf16> to vector<8x16xbf16>
    %128 = arith.truncf %125 : vector<16x64xf32> to vector<16x64xbf16>
    %cst_116 = arith.constant dense<0.000000e+00> : vector<8x64xf32>
    %129 = tpu.matmul %127, %128, %cst_116 {dimension_numbers = #tpu.dot_dimension_numbers<[1], [0], [0], [1], [0, 0, 1, 1], [], []>} : vector<8x16xbf16>, vector<16x64xbf16>, vector<8x64xf32> -> vector<8x64xf32>
    %130 = arith.addf %122, %129 : vector<8x64xf32>
    %c6_117 = arith.constant 6 : index
    %c0_118 = arith.constant 0 : index
    %c0_119 = arith.constant 0 : index
    %131 = vector.load %arg6[%c6_117, %c0_118, %c0_119] : memref<9x16x64xbf16, #tpu.memory_space<vmem>>, vector<1x16x64xbf16>
    %132 = vector.shape_cast %131 : vector<1x16x64xbf16> to vector<16x64xbf16>
    %cst_120 = arith.constant dense<0.000000e+00> : vector<16x64xf32>
    %133 = tpu.matmul %79, %132, %cst_120 {dimension_numbers = #tpu.dot_dimension_numbers<[1], [0], [0], [1], [0, 0, 1, 1], [], []>} : vector<16x16xbf16>, vector<16x64xbf16>, vector<16x64xf32> -> vector<16x64xf32>
    %c6_121 = arith.constant 6 : index
    %c0_122 = arith.constant 0 : index
    %c0_123 = arith.constant 0 : index
    %134 = vector.load %arg4[%c6_121, %c0_122, %c0_123] : memref<9x8x16xbf16, #tpu.memory_space<vmem>>, vector<1x8x16xbf16>
    %135 = vector.shape_cast %134 : vector<1x8x16xbf16> to vector<8x16xbf16>
    %136 = arith.truncf %133 : vector<16x64xf32> to vector<16x64xbf16>
    %cst_124 = arith.constant dense<0.000000e+00> : vector<8x64xf32>
    %137 = tpu.matmul %135, %136, %cst_124 {dimension_numbers = #tpu.dot_dimension_numbers<[1], [0], [0], [1], [0, 0, 1, 1], [], []>} : vector<8x16xbf16>, vector<16x64xbf16>, vector<8x64xf32> -> vector<8x64xf32>
    %138 = arith.addf %130, %137 : vector<8x64xf32>
    %c7_125 = arith.constant 7 : index
    %c0_126 = arith.constant 0 : index
    %c0_127 = arith.constant 0 : index
    %139 = vector.load %arg6[%c7_125, %c0_126, %c0_127] : memref<9x16x64xbf16, #tpu.memory_space<vmem>>, vector<1x16x64xbf16>
    %140 = vector.shape_cast %139 : vector<1x16x64xbf16> to vector<16x64xbf16>
    %cst_128 = arith.constant dense<0.000000e+00> : vector<16x64xf32>
    %141 = tpu.matmul %79, %140, %cst_128 {dimension_numbers = #tpu.dot_dimension_numbers<[1], [0], [0], [1], [0, 0, 1, 1], [], []>} : vector<16x16xbf16>, vector<16x64xbf16>, vector<16x64xf32> -> vector<16x64xf32>
    %c7_129 = arith.constant 7 : index
    %c0_130 = arith.constant 0 : index
    %c0_131 = arith.constant 0 : index
    %142 = vector.load %arg4[%c7_129, %c0_130, %c0_131] : memref<9x8x16xbf16, #tpu.memory_space<vmem>>, vector<1x8x16xbf16>
    %143 = vector.shape_cast %142 : vector<1x8x16xbf16> to vector<8x16xbf16>
    %144 = arith.truncf %141 : vector<16x64xf32> to vector<16x64xbf16>
    %cst_132 = arith.constant dense<0.000000e+00> : vector<8x64xf32>
    %145 = tpu.matmul %143, %144, %cst_132 {dimension_numbers = #tpu.dot_dimension_numbers<[1], [0], [0], [1], [0, 0, 1, 1], [], []>} : vector<8x16xbf16>, vector<16x64xbf16>, vector<8x64xf32> -> vector<8x64xf32>
    %146 = arith.addf %138, %145 : vector<8x64xf32>
    %c8_133 = arith.constant 8 : index
    %c0_134 = arith.constant 0 : index
    %c0_135 = arith.constant 0 : index
    %147 = vector.load %arg6[%c8_133, %c0_134, %c0_135] : memref<9x16x64xbf16, #tpu.memory_space<vmem>>, vector<1x16x64xbf16>
    %148 = vector.shape_cast %147 : vector<1x16x64xbf16> to vector<16x64xbf16>
    %cst_136 = arith.constant dense<0.000000e+00> : vector<16x64xf32>
    %149 = tpu.matmul %79, %148, %cst_136 {dimension_numbers = #tpu.dot_dimension_numbers<[1], [0], [0], [1], [0, 0, 1, 1], [], []>} : vector<16x16xbf16>, vector<16x64xbf16>, vector<16x64xf32> -> vector<16x64xf32>
    %c8_137 = arith.constant 8 : index
    %c0_138 = arith.constant 0 : index
    %c0_139 = arith.constant 0 : index
    %150 = vector.load %arg4[%c8_137, %c0_138, %c0_139] : memref<9x8x16xbf16, #tpu.memory_space<vmem>>, vector<1x8x16xbf16>
    %151 = vector.shape_cast %150 : vector<1x8x16xbf16> to vector<8x16xbf16>
    %152 = arith.truncf %149 : vector<16x64xf32> to vector<16x64xbf16>
    %cst_140 = arith.constant dense<0.000000e+00> : vector<8x64xf32>
    %153 = tpu.matmul %151, %152, %cst_140 {dimension_numbers = #tpu.dot_dimension_numbers<[1], [0], [0], [1], [0, 0, 1, 1], [], []>} : vector<8x16xbf16>, vector<16x64xbf16>, vector<8x64xf32> -> vector<8x64xf32>
    %154 = arith.addf %146, %153 : vector<8x64xf32>
    %cst_141 = arith.constant 0.000000e+00 : f32
    %155 = vector.broadcast %cst_141 : f32 to vector<8x64xf32>
    %156 = arith.maximumf %154, %155 : vector<8x64xf32>
    %157 = arith.truncf %156 : vector<8x64xf32> to vector<8x64xbf16>
    %c0_142 = arith.constant 0 : index
    %c0_143 = arith.constant 0 : index
    %158 = vector.load %arg8[%c0_142, %c0_143] : memref<6x1xf32, #tpu.memory_space<vmem>>, vector<6x1xf32>
    %159 = vector.shape_cast %158 : vector<6x1xf32> to vector<6x1xf32>
    %160 = vector.broadcast %159 : vector<6x1xf32> to vector<6x256xf32>
    %c0_144 = arith.constant 0 : index
    %c0_145 = arith.constant 0 : index
    %c0_146 = arith.constant 0 : index
    %161 = vector.load %arg9[%c0_144, %c0_145, %c0_146] : memref<9x64x256xbf16, #tpu.memory_space<vmem>>, vector<1x64x256xbf16>
    %162 = vector.shape_cast %161 : vector<1x64x256xbf16> to vector<64x256xbf16>
    %cst_147 = arith.constant dense<0.000000e+00> : vector<8x256xf32>
    %163 = tpu.matmul %157, %162, %cst_147 {dimension_numbers = #tpu.dot_dimension_numbers<[1], [0], [0], [1], [0, 0, 1, 1], [], []>} : vector<8x64xbf16>, vector<64x256xbf16>, vector<8x256xf32> -> vector<8x256xf32>
    %c0_148 = arith.constant 0 : index
    %c0_149 = arith.constant 0 : index
    %c0_150 = arith.constant 0 : index
    %164 = vector.load %arg7[%c0_148, %c0_149, %c0_150] : memref<9x6x8xbf16, #tpu.memory_space<vmem>>, vector<1x6x8xbf16>
    %165 = vector.shape_cast %164 : vector<1x6x8xbf16> to vector<6x8xbf16>
    %166 = arith.truncf %163 : vector<8x256xf32> to vector<8x256xbf16>
    %cst_151 = arith.constant dense<0.000000e+00> : vector<6x256xf32>
    %167 = tpu.matmul %165, %166, %cst_151 {dimension_numbers = #tpu.dot_dimension_numbers<[1], [0], [0], [1], [0, 0, 1, 1], [], []>} : vector<6x8xbf16>, vector<8x256xbf16>, vector<6x256xf32> -> vector<6x256xf32>
    %168 = arith.addf %160, %167 : vector<6x256xf32>
    %c1_152 = arith.constant 1 : index
    %c0_153 = arith.constant 0 : index
    %c0_154 = arith.constant 0 : index
    %169 = vector.load %arg9[%c1_152, %c0_153, %c0_154] : memref<9x64x256xbf16, #tpu.memory_space<vmem>>, vector<1x64x256xbf16>
    %170 = vector.shape_cast %169 : vector<1x64x256xbf16> to vector<64x256xbf16>
    %cst_155 = arith.constant dense<0.000000e+00> : vector<8x256xf32>
    %171 = tpu.matmul %157, %170, %cst_155 {dimension_numbers = #tpu.dot_dimension_numbers<[1], [0], [0], [1], [0, 0, 1, 1], [], []>} : vector<8x64xbf16>, vector<64x256xbf16>, vector<8x256xf32> -> vector<8x256xf32>
    %c1_156 = arith.constant 1 : index
    %c0_157 = arith.constant 0 : index
    %c0_158 = arith.constant 0 : index
    %172 = vector.load %arg7[%c1_156, %c0_157, %c0_158] : memref<9x6x8xbf16, #tpu.memory_space<vmem>>, vector<1x6x8xbf16>
    %173 = vector.shape_cast %172 : vector<1x6x8xbf16> to vector<6x8xbf16>
    %174 = arith.truncf %171 : vector<8x256xf32> to vector<8x256xbf16>
    %cst_159 = arith.constant dense<0.000000e+00> : vector<6x256xf32>
    %175 = tpu.matmul %173, %174, %cst_159 {dimension_numbers = #tpu.dot_dimension_numbers<[1], [0], [0], [1], [0, 0, 1, 1], [], []>} : vector<6x8xbf16>, vector<8x256xbf16>, vector<6x256xf32> -> vector<6x256xf32>
    %176 = arith.addf %168, %175 : vector<6x256xf32>
    %c2_160 = arith.constant 2 : index
    %c0_161 = arith.constant 0 : index
    %c0_162 = arith.constant 0 : index
    %177 = vector.load %arg9[%c2_160, %c0_161, %c0_162] : memref<9x64x256xbf16, #tpu.memory_space<vmem>>, vector<1x64x256xbf16>
    %178 = vector.shape_cast %177 : vector<1x64x256xbf16> to vector<64x256xbf16>
    %cst_163 = arith.constant dense<0.000000e+00> : vector<8x256xf32>
    %179 = tpu.matmul %157, %178, %cst_163 {dimension_numbers = #tpu.dot_dimension_numbers<[1], [0], [0], [1], [0, 0, 1, 1], [], []>} : vector<8x64xbf16>, vector<64x256xbf16>, vector<8x256xf32> -> vector<8x256xf32>
    %c2_164 = arith.constant 2 : index
    %c0_165 = arith.constant 0 : index
    %c0_166 = arith.constant 0 : index
    %180 = vector.load %arg7[%c2_164, %c0_165, %c0_166] : memref<9x6x8xbf16, #tpu.memory_space<vmem>>, vector<1x6x8xbf16>
    %181 = vector.shape_cast %180 : vector<1x6x8xbf16> to vector<6x8xbf16>
    %182 = arith.truncf %179 : vector<8x256xf32> to vector<8x256xbf16>
    %cst_167 = arith.constant dense<0.000000e+00> : vector<6x256xf32>
    %183 = tpu.matmul %181, %182, %cst_167 {dimension_numbers = #tpu.dot_dimension_numbers<[1], [0], [0], [1], [0, 0, 1, 1], [], []>} : vector<6x8xbf16>, vector<8x256xbf16>, vector<6x256xf32> -> vector<6x256xf32>
    %184 = arith.addf %176, %183 : vector<6x256xf32>
    %c3_168 = arith.constant 3 : index
    %c0_169 = arith.constant 0 : index
    %c0_170 = arith.constant 0 : index
    %185 = vector.load %arg9[%c3_168, %c0_169, %c0_170] : memref<9x64x256xbf16, #tpu.memory_space<vmem>>, vector<1x64x256xbf16>
    %186 = vector.shape_cast %185 : vector<1x64x256xbf16> to vector<64x256xbf16>
    %cst_171 = arith.constant dense<0.000000e+00> : vector<8x256xf32>
    %187 = tpu.matmul %157, %186, %cst_171 {dimension_numbers = #tpu.dot_dimension_numbers<[1], [0], [0], [1], [0, 0, 1, 1], [], []>} : vector<8x64xbf16>, vector<64x256xbf16>, vector<8x256xf32> -> vector<8x256xf32>
    %c3_172 = arith.constant 3 : index
    %c0_173 = arith.constant 0 : index
    %c0_174 = arith.constant 0 : index
    %188 = vector.load %arg7[%c3_172, %c0_173, %c0_174] : memref<9x6x8xbf16, #tpu.memory_space<vmem>>, vector<1x6x8xbf16>
    %189 = vector.shape_cast %188 : vector<1x6x8xbf16> to vector<6x8xbf16>
    %190 = arith.truncf %187 : vector<8x256xf32> to vector<8x256xbf16>
    %cst_175 = arith.constant dense<0.000000e+00> : vector<6x256xf32>
    %191 = tpu.matmul %189, %190, %cst_175 {dimension_numbers = #tpu.dot_dimension_numbers<[1], [0], [0], [1], [0, 0, 1, 1], [], []>} : vector<6x8xbf16>, vector<8x256xbf16>, vector<6x256xf32> -> vector<6x256xf32>
    %192 = arith.addf %184, %191 : vector<6x256xf32>
    %c4_176 = arith.constant 4 : index
    %c0_177 = arith.constant 0 : index
    %c0_178 = arith.constant 0 : index
    %193 = vector.load %arg9[%c4_176, %c0_177, %c0_178] : memref<9x64x256xbf16, #tpu.memory_space<vmem>>, vector<1x64x256xbf16>
    %194 = vector.shape_cast %193 : vector<1x64x256xbf16> to vector<64x256xbf16>
    %cst_179 = arith.constant dense<0.000000e+00> : vector<8x256xf32>
    %195 = tpu.matmul %157, %194, %cst_179 {dimension_numbers = #tpu.dot_dimension_numbers<[1], [0], [0], [1], [0, 0, 1, 1], [], []>} : vector<8x64xbf16>, vector<64x256xbf16>, vector<8x256xf32> -> vector<8x256xf32>
    %c4_180 = arith.constant 4 : index
    %c0_181 = arith.constant 0 : index
    %c0_182 = arith.constant 0 : index
    %196 = vector.load %arg7[%c4_180, %c0_181, %c0_182] : memref<9x6x8xbf16, #tpu.memory_space<vmem>>, vector<1x6x8xbf16>
    %197 = vector.shape_cast %196 : vector<1x6x8xbf16> to vector<6x8xbf16>
    %198 = arith.truncf %195 : vector<8x256xf32> to vector<8x256xbf16>
    %cst_183 = arith.constant dense<0.000000e+00> : vector<6x256xf32>
    %199 = tpu.matmul %197, %198, %cst_183 {dimension_numbers = #tpu.dot_dimension_numbers<[1], [0], [0], [1], [0, 0, 1, 1], [], []>} : vector<6x8xbf16>, vector<8x256xbf16>, vector<6x256xf32> -> vector<6x256xf32>
    %200 = arith.addf %192, %199 : vector<6x256xf32>
    %c5_184 = arith.constant 5 : index
    %c0_185 = arith.constant 0 : index
    %c0_186 = arith.constant 0 : index
    %201 = vector.load %arg9[%c5_184, %c0_185, %c0_186] : memref<9x64x256xbf16, #tpu.memory_space<vmem>>, vector<1x64x256xbf16>
    %202 = vector.shape_cast %201 : vector<1x64x256xbf16> to vector<64x256xbf16>
    %cst_187 = arith.constant dense<0.000000e+00> : vector<8x256xf32>
    %203 = tpu.matmul %157, %202, %cst_187 {dimension_numbers = #tpu.dot_dimension_numbers<[1], [0], [0], [1], [0, 0, 1, 1], [], []>} : vector<8x64xbf16>, vector<64x256xbf16>, vector<8x256xf32> -> vector<8x256xf32>
    %c5_188 = arith.constant 5 : index
    %c0_189 = arith.constant 0 : index
    %c0_190 = arith.constant 0 : index
    %204 = vector.load %arg7[%c5_188, %c0_189, %c0_190] : memref<9x6x8xbf16, #tpu.memory_space<vmem>>, vector<1x6x8xbf16>
    %205 = vector.shape_cast %204 : vector<1x6x8xbf16> to vector<6x8xbf16>
    %206 = arith.truncf %203 : vector<8x256xf32> to vector<8x256xbf16>
    %cst_191 = arith.constant dense<0.000000e+00> : vector<6x256xf32>
    %207 = tpu.matmul %205, %206, %cst_191 {dimension_numbers = #tpu.dot_dimension_numbers<[1], [0], [0], [1], [0, 0, 1, 1], [], []>} : vector<6x8xbf16>, vector<8x256xbf16>, vector<6x256xf32> -> vector<6x256xf32>
    %208 = arith.addf %200, %207 : vector<6x256xf32>
    %c6_192 = arith.constant 6 : index
    %c0_193 = arith.constant 0 : index
    %c0_194 = arith.constant 0 : index
    %209 = vector.load %arg9[%c6_192, %c0_193, %c0_194] : memref<9x64x256xbf16, #tpu.memory_space<vmem>>, vector<1x64x256xbf16>
    %210 = vector.shape_cast %209 : vector<1x64x256xbf16> to vector<64x256xbf16>
    %cst_195 = arith.constant dense<0.000000e+00> : vector<8x256xf32>
    %211 = tpu.matmul %157, %210, %cst_195 {dimension_numbers = #tpu.dot_dimension_numbers<[1], [0], [0], [1], [0, 0, 1, 1], [], []>} : vector<8x64xbf16>, vector<64x256xbf16>, vector<8x256xf32> -> vector<8x256xf32>
    %c6_196 = arith.constant 6 : index
    %c0_197 = arith.constant 0 : index
    %c0_198 = arith.constant 0 : index
    %212 = vector.load %arg7[%c6_196, %c0_197, %c0_198] : memref<9x6x8xbf16, #tpu.memory_space<vmem>>, vector<1x6x8xbf16>
    %213 = vector.shape_cast %212 : vector<1x6x8xbf16> to vector<6x8xbf16>
    %214 = arith.truncf %211 : vector<8x256xf32> to vector<8x256xbf16>
    %cst_199 = arith.constant dense<0.000000e+00> : vector<6x256xf32>
    %215 = tpu.matmul %213, %214, %cst_199 {dimension_numbers = #tpu.dot_dimension_numbers<[1], [0], [0], [1], [0, 0, 1, 1], [], []>} : vector<6x8xbf16>, vector<8x256xbf16>, vector<6x256xf32> -> vector<6x256xf32>
    %216 = arith.addf %208, %215 : vector<6x256xf32>
    %c7_200 = arith.constant 7 : index
    %c0_201 = arith.constant 0 : index
    %c0_202 = arith.constant 0 : index
    %217 = vector.load %arg9[%c7_200, %c0_201, %c0_202] : memref<9x64x256xbf16, #tpu.memory_space<vmem>>, vector<1x64x256xbf16>
    %218 = vector.shape_cast %217 : vector<1x64x256xbf16> to vector<64x256xbf16>
    %cst_203 = arith.constant dense<0.000000e+00> : vector<8x256xf32>
    %219 = tpu.matmul %157, %218, %cst_203 {dimension_numbers = #tpu.dot_dimension_numbers<[1], [0], [0], [1], [0, 0, 1, 1], [], []>} : vector<8x64xbf16>, vector<64x256xbf16>, vector<8x256xf32> -> vector<8x256xf32>
    %c7_204 = arith.constant 7 : index
    %c0_205 = arith.constant 0 : index
    %c0_206 = arith.constant 0 : index
    %220 = vector.load %arg7[%c7_204, %c0_205, %c0_206] : memref<9x6x8xbf16, #tpu.memory_space<vmem>>, vector<1x6x8xbf16>
    %221 = vector.shape_cast %220 : vector<1x6x8xbf16> to vector<6x8xbf16>
    %222 = arith.truncf %219 : vector<8x256xf32> to vector<8x256xbf16>
    %cst_207 = arith.constant dense<0.000000e+00> : vector<6x256xf32>
    %223 = tpu.matmul %221, %222, %cst_207 {dimension_numbers = #tpu.dot_dimension_numbers<[1], [0], [0], [1], [0, 0, 1, 1], [], []>} : vector<6x8xbf16>, vector<8x256xbf16>, vector<6x256xf32> -> vector<6x256xf32>
    %224 = arith.addf %216, %223 : vector<6x256xf32>
    %c8_208 = arith.constant 8 : index
    %c0_209 = arith.constant 0 : index
    %c0_210 = arith.constant 0 : index
    %225 = vector.load %arg9[%c8_208, %c0_209, %c0_210] : memref<9x64x256xbf16, #tpu.memory_space<vmem>>, vector<1x64x256xbf16>
    %226 = vector.shape_cast %225 : vector<1x64x256xbf16> to vector<64x256xbf16>
    %cst_211 = arith.constant dense<0.000000e+00> : vector<8x256xf32>
    %227 = tpu.matmul %157, %226, %cst_211 {dimension_numbers = #tpu.dot_dimension_numbers<[1], [0], [0], [1], [0, 0, 1, 1], [], []>} : vector<8x64xbf16>, vector<64x256xbf16>, vector<8x256xf32> -> vector<8x256xf32>
    %c8_212 = arith.constant 8 : index
    %c0_213 = arith.constant 0 : index
    %c0_214 = arith.constant 0 : index
    %228 = vector.load %arg7[%c8_212, %c0_213, %c0_214] : memref<9x6x8xbf16, #tpu.memory_space<vmem>>, vector<1x6x8xbf16>
    %229 = vector.shape_cast %228 : vector<1x6x8xbf16> to vector<6x8xbf16>
    %230 = arith.truncf %227 : vector<8x256xf32> to vector<8x256xbf16>
    %cst_215 = arith.constant dense<0.000000e+00> : vector<6x256xf32>
    %231 = tpu.matmul %229, %230, %cst_215 {dimension_numbers = #tpu.dot_dimension_numbers<[1], [0], [0], [1], [0, 0, 1, 1], [], []>} : vector<6x8xbf16>, vector<8x256xbf16>, vector<6x256xf32> -> vector<6x256xf32>
    %232 = arith.addf %224, %231 : vector<6x256xf32>
    %cst_216 = arith.constant 0.000000e+00 : f32
    %233 = vector.broadcast %cst_216 : f32 to vector<6x256xf32>
    %234 = arith.maximumf %232, %233 : vector<6x256xf32>
    %c0_217 = arith.constant 0 : index
    %c0_218 = arith.constant 0 : index
    %235 = vector.load %arg10[%c0_217, %c0_218] : memref<6x256xf32, #tpu.memory_space<vmem>>, vector<6x256xf32>
    tpu.vector_store %arg10[%c0_217, %c0_218], %234 {strides = array<i32>} : memref<6x256xf32, #tpu.memory_space<vmem>>, vector<6x256xf32>,
    return
  }
}

</mosaic_0001>

<bundles_post_ra>
// kernel: tile.28
= control target key start
LH: loop header
LB: loop body
LE: loop exit
PB: predicated region body
PF: predicated region fallthrough
CT: control target
= control target key end

     0   :  { %2 = vsyncpa [#allocation1], 0  ;;  %s44_s6 = smov [#allocation0]   ;;  %s70_s0 = inlined_call_operand.hbm [shape: f32[3], index: 0, kind: input, shape index: {}]   ;;  %s71_s1 = inlined_call_operand.vmem [shape: f32[2,3], index: 1, kind: output, shape index: {}]  }
   0x1   :  { %s9_s7 = sshll.u32 %s44_s6, 4  ;;  %s20_s10 = scalar_lea.hbm %s70_s0, 16  ;;  %s10_s7 = int_to_ptr.vmem [resolvable:$true] %s9_s7 }
   0x2   :  { %p21_p0 = scmp.ne.s32.totalorder %s70_s0, %s20_s10  ;;  %p24_p1 = scmp.lt.u32.totalorder %s20_s10, %s70_s0 }
   0x4   :  { %p26_p2 = pnand %p24_p1, %p21_p0 }
   0x6   :  { %29 = shalt.err (!%p26_p2)
}
   0x7   :  { %s30_s15 = scalar_lea.vmem %s10_s7, 16  ;;  %s34_s16 = scalar_lea.vmem %s10_s7, 32 }
   0x8   :  { %p31_p3 = scmp.ne.s32.totalorder %s10_s7, %s30_s15  ;;  %p35_p4 = scmp.lt.s32.totalorder %s10_s7, %s10_s7 }
   0x9   :  { %p36_p5 = scmp.lt.s32.totalorder %s34_s16, %s30_s15 }
   0xb   :  { %p37_p6 = por %p36_p5, %p35_p4 }
   0xd   :  { %p38_p7 = pnand %p37_p6, %p31_p3 }
   0xf   :  { %41 = shalt.err (!%p38_p7)
}
  0x10   :  { %12 = dma.hbm_to_vmem [thread:$0]  %s70_s0, 16, %s10_s7, [#allocation1]  }
  0x11   :  { %42 = dma.done.wait [#allocation1], 16  }
  0x12   :  { %43 = vsyncadd [#allocation1], 4294967280  ;;  %v16_v0 = vld [vmem:[#allocation0] ss:$0 sm:$0xff] }
  0x13   :  { %17 = vst [vmem:[%s71_s1] sm:$0x3] %v16_v0 }
  0x14   :  { %18 = vsyncpa [#allocation1], 1 }

// kernel: tile.18
= control target key start
LH: loop header
LB: loop body
LE: loop exit
PB: predicated region body
PF: predicated region fallthrough
CT: control target
= control target key end

     0   :  { %2 = vsyncpa [#allocation1], 0  ;;  %s44_s6 = smov [#allocation0]   ;;  %s70_s0 = inlined_call_operand.hbm [shape: f32[8], index: 0, kind: input, shape index: {}]   ;;  %s71_s1 = inlined_call_operand.vmem [shape: f32[2,8], index: 1, kind: output, shape index: {}]  }
   0x1   :  { %s9_s7 = sshll.u32 %s44_s6, 4  ;;  %s20_s10 = scalar_lea.hbm %s70_s0, 16  ;;  %s10_s7 = int_to_ptr.vmem [resolvable:$true] %s9_s7 }
   0x2   :  { %p21_p0 = scmp.ne.s32.totalorder %s70_s0, %s20_s10  ;;  %p24_p1 = scmp.lt.u32.totalorder %s20_s10, %s70_s0 }
   0x4   :  { %p26_p2 = pnand %p24_p1, %p21_p0 }
   0x6   :  { %29 = shalt.err (!%p26_p2)
}
   0x7   :  { %s30_s15 = scalar_lea.vmem %s10_s7, 16  ;;  %s34_s16 = scalar_lea.vmem %s10_s7, 32 }
   0x8   :  { %p31_p3 = scmp.ne.s32.totalorder %s10_s7, %s30_s15  ;;  %p35_p4 = scmp.lt.s32.totalorder %s10_s7, %s10_s7 }
   0x9   :  { %p36_p5 = scmp.lt.s32.totalorder %s34_s16, %s30_s15 }
   0xb   :  { %p37_p6 = por %p36_p5, %p35_p4 }
   0xd   :  { %p38_p7 = pnand %p37_p6, %p31_p3 }
   0xf   :  { %41 = shalt.err (!%p38_p7)
}
  0x10   :  { %12 = dma.hbm_to_vmem [thread:$0]  %s70_s0, 16, %s10_s7, [#allocation1]  }
  0x11   :  { %42 = dma.done.wait [#allocation1], 16  }
  0x12   :  { %43 = vsyncadd [#allocation1], 4294967280  ;;  %v16_v0 = vld [vmem:[#allocation0] ss:$0 sm:$0xff] }
  0x13   :  { %17 = vst [vmem:[%s71_s1] sm:$0x3] %v16_v0 }
  0x14   :  { %18 = vsyncpa [#allocation1], 1 }

// kernel: tile.23
= control target key start
LH: loop header
LB: loop body
LE: loop exit
PB: predicated region body
PF: predicated region fallthrough
CT: control target
= control target key end

     0   :  { %2 = vsyncpa [#allocation1], 0  ;;  %s44_s6 = smov [#allocation0]   ;;  %s70_s0 = inlined_call_operand.hbm [shape: f32[4], index: 0, kind: input, shape index: {}]   ;;  %s71_s1 = inlined_call_operand.vmem [shape: f32[2,4], index: 1, kind: output, shape index: {}]  }
   0x1   :  { %s9_s7 = sshll.u32 %s44_s6, 4  ;;  %s20_s10 = scalar_lea.hbm %s70_s0, 16  ;;  %s10_s7 = int_to_ptr.vmem [resolvable:$true] %s9_s7 }
   0x2   :  { %p21_p0 = scmp.ne.s32.totalorder %s70_s0, %s20_s10  ;;  %p24_p1 = scmp.lt.u32.totalorder %s20_s10, %s70_s0 }
   0x4   :  { %p26_p2 = pnand %p24_p1, %p21_p0 }
   0x6   :  { %29 = shalt.err (!%p26_p2)
}
   0x7   :  { %s30_s15 = scalar_lea.vmem %s10_s7, 16  ;;  %s34_s16 = scalar_lea.vmem %s10_s7, 32 }
   0x8   :  { %p31_p3 = scmp.ne.s32.totalorder %s10_s7, %s30_s15  ;;  %p35_p4 = scmp.lt.s32.totalorder %s10_s7, %s10_s7 }
   0x9   :  { %p36_p5 = scmp.lt.s32.totalorder %s34_s16, %s30_s15 }
   0xb   :  { %p37_p6 = por %p36_p5, %p35_p4 }
   0xd   :  { %p38_p7 = pnand %p37_p6, %p31_p3 }
   0xf   :  { %41 = shalt.err (!%p38_p7)
}
  0x10   :  { %12 = dma.hbm_to_vmem [thread:$0]  %s70_s0, 16, %s10_s7, [#allocation1]  }
  0x11   :  { %42 = dma.done.wait [#allocation1], 16  }
  0x12   :  { %43 = vsyncadd [#allocation1], 4294967280  ;;  %v16_v0 = vld [vmem:[#allocation0] ss:$0 sm:$0xff] }
  0x13   :  { %17 = vst [vmem:[%s71_s1] sm:$0x3] %v16_v0 }
  0x14   :  { %18 = vsyncpa [#allocation1], 1 }

// kernel: tile.2
= control target key start
LH: loop header
LB: loop body
LE: loop exit
PB: predicated region body
PF: predicated region fallthrough
CT: control target
= control target key end

     0   :  { %vm7_vm0 = vcmask 7168   ;;  %s26_s10 = smov 126   ;;  %s49_s0 = inlined_call_operand.vmem [shape: f32[2,3], index: 0, kind: input, shape index: {}]   ;;  %s50_s1 = inlined_call_operand.vmem [shape: f32[6,1], index: 1, kind: output, shape index: {}]  }
   0x1   :  { %v4_v0 = vld [vmem:[%s49_s0] sm:$0x3]  ;;  %s25_s0 = smov 127  }
   0x2   :  { %5 = vst [vmem:[#allocation0] sm:$0x3] %v4_v0 }
   0x9   :  { %v9_v1 = vld [vmem:[#allocation0] sm:$0x3]  }
   0xa   :  { %v6_v2 = vld [vmem:[#allocation0] sm:$0x3]   ;;  %10 = vrot.lane.b32.xlu0 %v9_v1, %s25_s0 }
   0xb   :  { %8 = vst.msk [vmem:[%s50_s1] ss:$3 sm:$0x3] %vm7_vm0, %v6_v2   ;;  %v15_v3 = vld [vmem:[#allocation0] sm:$0x3]  }
   0xe   :  { %16 = vrot.lane.b32.xlu0 %v15_v3, %s26_s10 }
  0x7c   :  { %v11_v4 = vpop.permute.xlu0 %10  }
  0x7d   :  { %21 = vst.msk [vmem:[%s50_s1 + $0x1] ss:$3 sm:$0x3] %vm7_vm0, %v11_v4  }
  0x80   :  { %v17_v5 = vpop.permute.xlu0 %16  }
  0x81   :  { %22 = vst.msk [vmem:[%s50_s1 + $0x2] ss:$3 sm:$0x3] %vm7_vm0, %v17_v5  }

// kernel: tile.1
= control target key start
LH: loop header
LB: loop body
LE: loop exit
PB: predicated region body
PF: predicated region fallthrough
CT: control target
= control target key end

     0   :  { %s34_s8 = smov 125   ;;  %vm7_vm0 = vcmask 7168   ;;  %s35_s11 = smov 126   ;;  %s61_s0 = inlined_call_operand.vmem [shape: f32[2,4], index: 0, kind: input, shape index: {}]   ;;  %s62_s1 = inlined_call_operand.vmem [shape: f32[8,1], index: 1, kind: output, shape index: {}]  }
   0x1   :  { %v4_v0 = vld [vmem:[%s61_s0] sm:$0x3]  ;;  %s33_s0 = smov 127  }
   0x2   :  { %5 = vst [vmem:[#allocation0] sm:$0x3] %v4_v0 }
   0x9   :  { %v9_v1 = vld [vmem:[#allocation0] sm:$0x3]  }
   0xa   :  { %v21_v2 = vld [vmem:[#allocation0] sm:$0x3]   ;;  %10 = vrot.lane.b32.xlu0 %v9_v1, %s33_s0 }
   0xb   :  { %22 = vrot.lane.b32.xlu1 %v21_v2, %s34_s8  ;;  %v6_v3 = vld [vmem:[#allocation0] sm:$0x3]  }
   0xc   :  { %v15_v4 = vld [vmem:[#allocation0] sm:$0x3]   ;;  %8 = vst.msk [vmem:[%s62_s1] ss:$4 sm:$0x3] %vm7_vm0, %v6_v3  }
   0xe   :  { %16 = vrot.lane.b32.xlu0 %v15_v4, %s35_s11 }
  0x7c   :  { %v11_v5 = vpop.permute.xlu0 %10  }
  0x7d   :  { %v23_v6 = vpop.permute.xlu1 %22   ;;  %27 = vst.msk [vmem:[%s62_s1 + $0x1] ss:$4 sm:$0x3] %vm7_vm0, %v11_v5  }
  0x7e   :  { %29 = vst.msk [vmem:[%s62_s1 + $0x3] ss:$4 sm:$0x3] %vm7_vm0, %v23_v6  }
  0x80   :  { %v17_v7 = vpop.permute.xlu0 %16  }
  0x81   :  { %28 = vst.msk [vmem:[%s62_s1 + $0x2] ss:$4 sm:$0x3] %vm7_vm0, %v17_v7  }

// kernel: tile.0
= control target key start
LH: loop header
LB: loop body
LE: loop exit
PB: predicated region body
PF: predicated region fallthrough
CT: control target
= control target key end

     0   :  { %s66_s8 = smov 125   ;;  %vm7_vm0 = vcmask 7168   ;;  %s67_s11 = smov 126   ;;  %s117_s0 = inlined_call_operand.vmem [shape: f32[2,8], index: 0, kind: input, shape index: {}]   ;;  %s118_s1 = inlined_call_operand.vmem [shape: f32[16,1], index: 1, kind: output, shape index: {}]  }
   0x1   :  { %v4_v0 = vld [vmem:[%s117_s0] sm:$0x3]  ;;  %s65_s0 = smov 127   ;;  %s68_s12 = smov 124  }
   0x2   :  { %5 = vst [vmem:[#allocation0] sm:$0x3] %v4_v0  ;;  %s69_s13 = smov 123   ;;  %s70_s14 = smov 122  }
   0x3   :  { %s71_s15 = smov 121  }
   0x9   :  { %v9_v1 = vld [vmem:[#allocation0] sm:$0x3]  }
   0xa   :  { %v21_v2 = vld [vmem:[#allocation0] sm:$0x3]   ;;  %10 = vrot.lane.b32.xlu0 %v9_v1, %s65_s0 }
   0xb   :  { %22 = vrot.lane.b32.xlu1 %v21_v2, %s66_s8  ;;  %v15_v3 = vld [vmem:[#allocation0] sm:$0x3]  }
   0xc   :  { %v27_v4 = vld [vmem:[#allocation0] sm:$0x3]  }
   0xd   :  { %v6_v5 = vld [vmem:[#allocation0] sm:$0x3]  }
   0xe   :  { %8 = vst.msk [vmem:[%s118_s1] ss:$8 sm:$0x3] %vm7_vm0, %v6_v5   ;;  %16 = vrot.lane.b32.xlu0 %v15_v3, %s67_s11  ;;  %v33_v6 = vld [vmem:[#allocation0] sm:$0x3]  }
   0xf   :  { %28 = vrot.lane.b32.xlu1 %v27_v4, %s68_s12  ;;  %v39_v7 = vld [vmem:[#allocation0] sm:$0x3]  }
  0x10   :  { %v45_v8 = vld [vmem:[#allocation0] sm:$0x3]  }
  0x12   :  { %34 = vrot.lane.b32.xlu0 %v33_v6, %s69_s13 }
  0x13   :  { %40 = vrot.lane.b32.xlu1 %v39_v7, %s70_s14 }
  0x16   :  { %46 = vrot.lane.b32.xlu0 %v45_v8, %s71_s15 }
  0x7c   :  { %v11_v9 = vpop.permute.xlu0 %10  }
  0x7d   :  { %v23_v10 = vpop.permute.xlu1 %22   ;;  %51 = vst.msk [vmem:[%s118_s1 + $0x1] ss:$8 sm:$0x3] %vm7_vm0, %v11_v9  }
  0x7e   :  { %53 = vst.msk [vmem:[%s118_s1 + $0x3] ss:$8 sm:$0x3] %vm7_vm0, %v23_v10  }
  0x80   :  { %v17_v11 = vpop.permute.xlu0 %16  }
  0x81   :  { %v29_v12 = vpop.permute.xlu1 %28   ;;  %52 = vst.msk [vmem:[%s118_s1 + $0x2] ss:$8 sm:$0x3] %vm7_vm0, %v17_v11  }
  0x82   :  { %54 = vst.msk [vmem:[%s118_s1 + $0x4] ss:$8 sm:$0x3] %vm7_vm0, %v29_v12  }
  0x84   :  { %v35_v13 = vpop.permute.xlu0 %34  }
  0x85   :  { %v41_v14 = vpop.permute.xlu1 %40   ;;  %55 = vst.msk [vmem:[%s118_s1 + $0x5] ss:$8 sm:$0x3] %vm7_vm0, %v35_v13  }
  0x86   :  { %56 = vst.msk [vmem:[%s118_s1 + $0x6] ss:$8 sm:$0x3] %vm7_vm0, %v41_v14  }
  0x88   :  { %v47_v15 = vpop.permute.xlu0 %46  }
  0x89   :  { %57 = vst.msk [vmem:[%s118_s1 + $0x7] ss:$8 sm:$0x3] %vm7_vm0, %v47_v15  }

// kernel: decoder_forward.1
= control target key start
LH: loop header
LB: loop body
LE: loop exit
PB: predicated region body
PF: predicated region fallthrough
CT: control target
= control target key end

     0   :  { %vm62_vm0 = vcmask 1041408   ;;  %vm55_vm1 = vcmask 31744   ;;  %v4116_v24 = vmov 0.0   ;;  %vm4117_vm2 = vmmov 0   ;;  %s4799_s3 = inlined_call_operand.vmem [shape: bf16[9,4,16], index: 3, kind: input, shape index: {}]   ;;  %s4800_s0 = inlined_call_operand.vmem [shape: f32[32,4], index: 0, kind: input, shape index: {}]   ;;  %s4801_s1 = inlined_call_operand.vmem [shape: bf16[9,16,32], index: 1, kind: input, shape index: {}]   ;;  %s4802_s2 = inlined_call_operand.vmem [shape: f32[16,1], index: 2, kind: input, shape index: {}]   ;;  %s4803_s6 = inlined_call_operand.vmem [shape: bf16[9,16,64], index: 6, kind: input, shape index: {}]   ;;  %s4804_s5 = inlined_call_operand.vmem [shape: f32[8,1], index: 5, kind: input, shape index: {}]   ;;  %s4805_s8 = inlined_call_operand.vmem [shape: f32[6,1], index: 8, kind: input, shape index: {}]   ;;  %s4806_s9 = inlined_call_operand.vmem [shape: bf16[9,64,256], index: 9, kind: input, shape index: {}]   ;;  %s4807_s4 = inlined_call_operand.vmem [shape: bf16[9,8,16], index: 4, kind: input, shape index: {}]   ;;  %s4808_s7 = inlined_call_operand.vmem [shape: bf16[9,6,8], index: 7, kind: input, shape index: {}]   ;;  %s4809_s10 = inlined_call_operand.vmem [shape: f32[6,256], index: 10, kind: output, shape index: {}]  }
   0x1   :  { %v54_v0 = vld [vmem:[%s4799_s3] sm:$0x3]  ;;  %v37_v2 = vld [vmem:[%s4800_s0 + $0x8] sm:$0xff]  ;;  %v38_v5 = vld [vmem:[%s4800_s0 + $0x10] sm:$0xff]  ;;  %3647 = vmatprep.subr.bf16.mxu1 %v4116_v24  ;;  %3651 = vmatprep.mubr.msk.bf16.mxu1 %vm4117_vm2, %v4116_v24  ;;  %v4118_v25 = vmov 0   ;;  %vm124_vm3 = vcmask 261120  }
   0x2   :  { %v36_v1 = vld [vmem:[%s4800_s0] sm:$0xff]  ;;  %3976 = vmatprep.subr.msk.bf16.mxu0 %vm62_vm0, %v54_v0  ;;  %v64_v3 = vsel %vm62_vm0, %v54_v0, 0  ;;  %v39_v6 = vld [vmem:[%s4800_s0 + $0x18] sm:$0xff]  ;;  %v3294_v14 = vld [vmem:[%s4799_s3 + $0x8] sm:$0x3]  ;;  %3988 = vset.pattern.permute.xlu0 %v4118_v25  ;;  %vm1068_vm4 = vcmask 130048  }
   0x3   :  { %v40_v4 = vpack.c.bf16 %v37_v2, %v36_v1  ;;  %v3273_v7 = vld [vmem:[%s4799_s3 + $0x2] sm:$0x3]  ;;  %3642 = vmatpush3.bf16.msra.mxu0 %v64_v3  ;;  %v41_v8 = vpack.c.bf16 %v39_v6, %v38_v5  ;;  %v3280_v10 = vld [vmem:[%s4799_s3 + $0x4] sm:$0x3]  ;;  %v3287_v12 = vld [vmem:[%s4799_s3 + $0x6] sm:$0x3]  ;;  %3989 = vset.pattern.permute.xlu1 %v4118_v25 }
   0x4   :  { %3977 = vmatprep.subr.msk.bf16.mxu0 %vm62_vm0, %v3273_v7  ;;  %v174_v9 = vsel %vm62_vm0, %v3273_v7, 0  ;;  %v284_v11 = vsel %vm62_vm0, %v3280_v10, 0  ;;  %v394_v13 = vsel %vm62_vm0, %v3287_v12, 0  ;;  %v504_v15 = vsel %vm62_vm0, %v3294_v14, 0  ;;  %v3301_v16 = vld [vmem:[%s4799_s3 + $0xa] sm:$0x3] }
   0x5   :  { %3643 = vmatprep.mubr.msk.bf16.mxu0 %vm55_vm1, %v40_v4  ;;  %v614_v17 = vsel %vm62_vm0, %v3301_v16, 0  ;;  %v3308_v18 = vld [vmem:[%s4799_s3 + $0xc] sm:$0x3]  ;;  %v3315_v20 = vld [vmem:[%s4799_s3 + $0xe] sm:$0x3]  ;;  %v42_v26 = vld [vmem:[%s4802_s2] sm:$0xff] }
   0x6   :  { %3644 = vmatmul.mubr.msk.bf16.vlgmr.msra.gmra.mrb[0].mxu0 %vm55_vm1, %v41_v8  ;;  %v724_v19 = vsel %vm62_vm0, %v3308_v18, 0  ;;  %v834_v21 = vsel %vm62_vm0, %v3315_v20, 0  ;;  %v3322_v22 = vld [vmem:[%s4799_s3 + $0x10] sm:$0x3]  ;;  %46 = vperm.xlu0 %3988, %v42_v26   ;;  %v43_v27 = vld [vmem:[%s4802_s2 + $0x8] sm:$0xff]  ;;  %v3990_v36 = vld [vmem:[%s4801_s1] sm:$0xff]  }
   0x7   :  { %3656 = vmatpush3.bf16.msra.mxu0 %v174_v9  ;;  %3657 = vmatprep.mubr.msk.bf16.mxu0 %vm55_vm1, %v40_v4  ;;  %v944_v23 = vsel %vm62_vm0, %v3322_v22, 0  ;;  %v3991_v47 = vld [vmem:[%s4801_s1 + $0x8] sm:$0xff]   ;;  %v3992_v55 = vld [vmem:[%s4801_s1 + $0x10] sm:$0xff]   ;;  %v3993_v3 = vld [vmem:[%s4801_s1 + $0x18] sm:$0xff]   ;;  %vm1991_vm5 = vcmask 523264   ;;  %vm2043_vm6 = vcmask 1043456  }
   0x8   :  { %3978 = vmatprep.subr.msk.bf16.mxu0 %vm62_vm0, %v3280_v10  ;;  %v3996_v26 = vld [vmem:[%s4801_s1 + $0x30] sm:$0xff]   ;;  %vm2039_vm7 = vcmask 64512  }
   0xa   :  { %51 = vperm.xlu0 %3988, %v43_v27   ;;  %v3997_v27 = vld [vmem:[%s4801_s1 + $0x38] sm:$0xff]  }
   0xe   :  { %3658 = vmatmul.mubr.msk.bf16.vlgmr.msra.gmra.mrb[4].mxu0 %vm55_vm1, %v41_v8 }
   0xf   :  { %3670 = vmatpush3.bf16.msra.mxu0 %v284_v11  ;;  %3671 = vmatprep.mubr.msk.bf16.mxu0 %vm55_vm1, %v40_v4  ;;  %v3994_v11 = vld [vmem:[%s4801_s1 + $0x20] sm:$0xff]  }
  0x10   :  { %3979 = vmatprep.subr.msk.bf16.mxu0 %vm62_vm0, %v3287_v12 }
  0x16   :  { %3672 = vmatmul.mubr.msk.bf16.vlgmr.msra.gmra.mrb[8].mxu0 %vm55_vm1, %v41_v8 }
  0x17   :  { %3684 = vmatpush3.bf16.msra.mxu0 %v394_v13  ;;  %3685 = vmatprep.mubr.msk.bf16.mxu0 %vm55_vm1, %v40_v4 }
  0x18   :  { %3980 = vmatprep.subr.msk.bf16.mxu0 %vm62_vm0, %v3294_v14 }
  0x1e   :  { %3686 = vmatmul.mubr.msk.bf16.vlgmr.msra.gmra.mrb[12].mxu0 %vm55_vm1, %v41_v8 }
  0x1f   :  { %3698 = vmatpush3.bf16.msra.mxu0 %v504_v15  ;;  %3699 = vmatprep.mubr.msk.bf16.mxu0 %vm55_vm1, %v40_v4 }
  0x20   :  { %3981 = vmatprep.subr.msk.bf16.mxu0 %vm62_vm0, %v3301_v16 }
  0x26   :  { %3700 = vmatmul.mubr.msk.bf16.vlgmr.msra.gmra.mrb[16].mxu0 %vm55_vm1, %v41_v8 }
  0x27   :  { %3712 = vmatpush3.bf16.msra.mxu0 %v614_v17  ;;  %3713 = vmatprep.mubr.msk.bf16.mxu0 %vm55_vm1, %v40_v4 }
  0x28   :  { %3982 = vmatprep.subr.msk.bf16.mxu0 %vm62_vm0, %v3308_v18 }
  0x2e   :  { %3714 = vmatmul.mubr.msk.bf16.vlgmr.msra.gmra.mrb[20].mxu0 %vm55_vm1, %v41_v8 }
  0x2f   :  { %3726 = vmatpush3.bf16.msra.mxu0 %v724_v19  ;;  %3727 = vmatprep.mubr.msk.bf16.mxu0 %vm55_vm1, %v40_v4 }
  0x30   :  { %3983 = vmatprep.subr.msk.bf16.mxu0 %vm62_vm0, %v3315_v20 }
  0x36   :  { %3728 = vmatmul.mubr.msk.bf16.vlgmr.msra.gmra.mrb[24].mxu0 %vm55_vm1, %v41_v8 }
  0x37   :  { %3740 = vmatpush3.bf16.msra.mxu0 %v834_v21  ;;  %3741 = vmatprep.mubr.msk.bf16.mxu0 %vm55_vm1, %v40_v4 }
  0x38   :  { %3984 = vmatprep.subr.msk.bf16.mxu0 %vm62_vm0, %v3322_v22 }
  0x3e   :  { %3742 = vmatmul.mubr.msk.bf16.vlgmr.msra.gmra.mrb[28].mxu0 %vm55_vm1, %v41_v8 }
  0x3f   :  { %3754 = vmatpush3.bf16.msra.mxu0 %v944_v23  ;;  %3755 = vmatprep.mubr.msk.bf16.mxu0 %vm55_vm1, %v40_v4  ;;  %v3995_v23 = vld [vmem:[%s4801_s1 + $0x28] sm:$0xff]  }
  0x40   :  { %3767 = vmatprep.subr.bf16.mxu0 %v4116_v24 }
  0x46   :  { %3756 = vmatmul.mubr.msk.bf16.vlgmr.msra.gmra.mrb[32].mxu0 %vm55_vm1, %v41_v8 }
  0x47   :  { %3769 = vmatprep.mubr.msk.bf16.mxu0 %vm4117_vm2, %v4116_v24 }
  0xd9   :  { %v3645_v28 = vpop.f32.mrb[0].mxu0 }
  0xda   :  { %v100_v29 = vpop.f32.mrb[1].mxu0 }
  0xdb   :  { %v3646_v30 = vpop.f32.mrb[2].mxu0 }
  0xdc   :  { %v118_v31 = vpack.c.bf16 %v3646_v30, %v3645_v28  ;;  %v103_v32 = vpop.f32.mrb[3].mxu0  ;;  %v3998_v28 = vld [vmem:[%s4801_s1 + $0x40] sm:$0xff]   ;;  %v47_v30 = vpop.permute.xlu0 %46 }
  0xdd   :  { %v117_v33 = vpack.c.bf16 %v103_v32, %v100_v29  ;;  %v3999_v29 = vld [vmem:[%s4803_s6] sm:$0xff]  }
  0xde   :  { %3768 = vmatpush3.bf16.msra.mxu0 %v3999_v29 }
  0xdf   :  { %3648 = vmatpush3.bf16.msra.mxu1 %v117_v33  ;;  %3779 = vmatprep.subr.bf16.mxu0 %v4116_v24 }
  0xe0   :  { %3649 = vmatprep.subr.bf16.mxu1 %v4116_v24 }
  0xe1   :  { %v3659_v34 = vpop.f32.mrb[4].mxu0 }
  0xe2   :  { %v210_v35 = vpop.f32.mrb[5].mxu0 }
  0xe3   :  { %3650 = vmatpush3.bf16.msra.mxu1 %v118_v31  ;;  %v3660_v37 = vpop.f32.mrb[6].mxu0 }
  0xe4   :  { %v229_v38 = vpack.c.bf16 %v3660_v37, %v3659_v34  ;;  %v213_v39 = vpop.f32.mrb[7].mxu0  ;;  %3661 = vmatprep.subr.bf16.mxu1 %v4116_v24  ;;  %v52_v34 = vpop.permute.xlu0 %51 }
  0xe5   :  { %v228_v40 = vpack.c.bf16 %v213_v39, %v210_v35 }
  0xe6   :  { %3652 = vmatmul.mubr.msk.bf16.vlgmr.msra.gmra.mrb[0].mxu1 %vm124_vm3, %v3990_v36 }
  0xe7   :  { %3662 = vmatpush3.bf16.msra.mxu1 %v228_v40  ;;  %3665 = vmatprep.mubr.msk.bf16.mxu1 %vm4117_vm2, %v4116_v24  ;;  %v4000_v40 = vld [vmem:[%s4803_s6 + $0x8] sm:$0xff]  }
  0xe8   :  { %3663 = vmatprep.subr.bf16.mxu1 %v4116_v24 }
  0xe9   :  { %v3673_v41 = vpop.f32.mrb[8].mxu0 }
  0xea   :  { %v320_v42 = vpop.f32.mrb[9].mxu0 }
  0xeb   :  { %3664 = vmatpush3.bf16.msra.mxu1 %v229_v38  ;;  %v3674_v43 = vpop.f32.mrb[10].mxu0 }
  0xec   :  { %v339_v44 = vpack.c.bf16 %v3674_v43, %v3673_v41  ;;  %v323_v45 = vpop.f32.mrb[11].mxu0  ;;  %3675 = vmatprep.subr.bf16.mxu1 %v4116_v24  ;;  %v4002_v43 = vld [vmem:[%s4803_s6 + $0x18] sm:$0xff]  }
  0xed   :  { %v338_v46 = vpack.c.bf16 %v323_v45, %v320_v42  ;;  %v4001_v42 = vld [vmem:[%s4803_s6 + $0x10] sm:$0xff]   ;;  %v4004_v45 = vld [vmem:[%s4803_s6 + $0x28] sm:$0xff]  }
  0xf1   :  { %v3687_v48 = vpop.f32.mrb[12].mxu0 }
  0xf2   :  { %3666 = vmatmul.mubr.msk.bf16.vlgmr.msra.gmra.mrb[0].mxu1 %vm124_vm3, %v3991_v47  ;;  %v430_v49 = vpop.f32.mrb[13].mxu0  ;;  %v4006_v47 = vld [vmem:[%s4803_s6 + $0x38] sm:$0xff]  }
  0xf3   :  { %3676 = vmatpush3.bf16.msra.mxu1 %v338_v46  ;;  %v3688_v50 = vpop.f32.mrb[14].mxu0  ;;  %3679 = vmatprep.mubr.msk.bf16.mxu1 %vm4117_vm2, %v4116_v24  ;;  %v4005_v46 = vld [vmem:[%s4803_s6 + $0x30] sm:$0xff]  }
  0xf4   :  { %3677 = vmatprep.subr.bf16.mxu1 %v4116_v24  ;;  %v449_v51 = vpack.c.bf16 %v3688_v50, %v3687_v48  ;;  %v433_v52 = vpop.f32.mrb[15].mxu0  ;;  %v4007_v48 = vld [vmem:[%s4803_s6 + $0x40] sm:$0xff]  }
  0xf5   :  { %v448_v53 = vpack.c.bf16 %v433_v52, %v430_v49  ;;  %v1054_v49 = vld [vmem:[%s4804_s5] sm:$0xff] }
  0xf6   :  { %1057 = vperm.xlu1 %3989, %v1054_v49   ;;  %v4008_v50 = vld [vmem:[%s4806_s9] ss:$8 sps:$4 sm:$0xff]   ;;  %v4019_v49 = vld [vmem:[%s4806_s9 + $0x34] ss:$8 sps:$4 sm:$0xff]  }
  0xf7   :  { %3678 = vmatpush3.bf16.msra.mxu1 %v339_v44  ;;  %v4003_v44 = vld [vmem:[%s4803_s6 + $0x20] sm:$0xff]  }
  0xf8   :  { %3689 = vmatprep.subr.bf16.mxu1 %v4116_v24  ;;  %v1937_v52 = vld [vmem:[%s4805_s8] sm:$0x3f] }
  0xf9   :  { %v3701_v54 = vpop.f32.mrb[16].mxu0 }
  0xfa   :  { %v540_v56 = vpop.f32.mrb[17].mxu0  ;;  %1940 = vperm.xlu1 %3989, %v1937_v52  }
  0xfb   :  { %v3702_v57 = vpop.f32.mrb[18].mxu0 }
  0xfc   :  { %v559_v58 = vpack.c.bf16 %v3702_v57, %v3701_v54  ;;  %v543_v59 = vpop.f32.mrb[19].mxu0  ;;  %v4011_v54 = vld [vmem:[%s4806_s9 + $0x10] ss:$8 sps:$4 sm:$0xff]  }
  0xfd   :  { %v558_v60 = vpack.c.bf16 %v543_v59, %v540_v56  ;;  %v4014_v56 = vld [vmem:[%s4806_s9 + $0x20] ss:$8 sps:$4 sm:$0xff]  }
  0xfe   :  { %3680 = vmatmul.mubr.msk.bf16.vlgmr.msra.gmra.mrb[0].mxu1 %vm124_vm3, %v3992_v55  ;;  %v4016_v55 = vld [vmem:[%s4806_s9 + $0x24] ss:$8 sps:$4 sm:$0xff]  }
  0xff   :  { %3690 = vmatpush3.bf16.msra.mxu1 %v448_v53  ;;  %3693 = vmatprep.mubr.msk.bf16.mxu1 %vm4117_vm2, %v4116_v24  ;;  %v4013_v53 = vld [vmem:[%s4806_s9 + $0x14] ss:$8 sps:$4 sm:$0xff]  }
 0x100   :  { %3691 = vmatprep.subr.bf16.mxu1 %v4116_v24 }
 0x101   :  { %v3715_v61 = vpop.f32.mrb[20].mxu0 }
 0x102   :  { %v650_v62 = vpop.f32.mrb[21].mxu0 }
 0x103   :  { %3692 = vmatpush3.bf16.msra.mxu1 %v449_v51  ;;  %v3716_v63 = vpop.f32.mrb[22].mxu0  ;;  %v4010_v51 = vld [vmem:[%s4806_s9 + $0x4] ss:$8 sps:$4 sm:$0xff]  }
 0x104   :  { %3703 = vmatprep.subr.bf16.mxu1 %v4116_v24  ;;  %v669_v0 = vpack.c.bf16 %v3716_v63, %v3715_v61  ;;  %v653_v1 = vpop.f32.mrb[23].mxu0 }
 0x105   :  { %v668_v2 = vpack.c.bf16 %v653_v1, %v650_v62  ;;  %v1113_v62 = vld [vmem:[%s4807_s4] sm:$0xf] }
 0x109   :  { %v3729_v4 = vpop.f32.mrb[24].mxu0 }
 0x10a   :  { %3694 = vmatmul.mubr.msk.bf16.vlgmr.msra.gmra.mrb[0].mxu1 %vm124_vm3, %v3993_v3  ;;  %v760_v5 = vpop.f32.mrb[25].mxu0 }
 0x10b   :  { %3704 = vmatpush3.bf16.msra.mxu1 %v558_v60  ;;  %3707 = vmatprep.mubr.msk.bf16.mxu1 %vm4117_vm2, %v4116_v24  ;;  %v3730_v6 = vpop.f32.mrb[26].mxu0 }
 0x10c   :  { %3705 = vmatprep.subr.bf16.mxu1 %v4116_v24  ;;  %v779_v7 = vpack.c.bf16 %v3730_v6, %v3729_v4  ;;  %v763_v8 = vpop.f32.mrb[27].mxu0  ;;  %v3336_v6 = vld [vmem:[%s4807_s4 + $0x4] sm:$0xf] }
 0x10d   :  { %v778_v9 = vpack.c.bf16 %v763_v8, %v760_v5 }
 0x10f   :  { %3706 = vmatpush3.bf16.msra.mxu1 %v559_v58 }
 0x110   :  { %3717 = vmatprep.subr.bf16.mxu1 %v4116_v24 }
 0x111   :  { %v3743_v10 = vpop.f32.mrb[28].mxu0 }
 0x112   :  { %v870_v12 = vpop.f32.mrb[29].mxu0 }
 0x113   :  { %v3744_v13 = vpop.f32.mrb[30].mxu0 }
 0x114   :  { %v889_v14 = vpack.c.bf16 %v3744_v13, %v3743_v10  ;;  %v873_v15 = vpop.f32.mrb[31].mxu0 }
 0x115   :  { %v888_v16 = vpack.c.bf16 %v873_v15, %v870_v12  ;;  %v3342_v15 = vld [vmem:[%s4807_s4 + $0x8] sm:$0xf] }
 0x116   :  { %3708 = vmatmul.mubr.msk.bf16.vlgmr.msra.gmra.mrb[0].mxu1 %vm124_vm3, %v3994_v11 }
 0x117   :  { %3718 = vmatpush3.bf16.msra.mxu1 %v668_v2  ;;  %3721 = vmatprep.mubr.msk.bf16.mxu1 %vm4117_vm2, %v4116_v24 }
 0x118   :  { %3719 = vmatprep.subr.bf16.mxu1 %v4116_v24 }
 0x119   :  { %v3757_v17 = vpop.f32.mrb[32].mxu0 }
 0x11a   :  { %v980_v18 = vpop.f32.mrb[33].mxu0 }
 0x11b   :  { %3720 = vmatpush3.bf16.msra.mxu1 %v669_v0  ;;  %v3758_v19 = vpop.f32.mrb[34].mxu0 }
 0x11c   :  { %3731 = vmatprep.subr.bf16.mxu1 %v4116_v24  ;;  %v999_v20 = vpack.c.bf16 %v3758_v19, %v3757_v17  ;;  %v983_v21 = vpop.f32.mrb[35].mxu0 }
 0x11d   :  { %v998_v22 = vpack.c.bf16 %v983_v21, %v980_v18 }
 0x122   :  { %3722 = vmatmul.mubr.msk.bf16.vlgmr.msra.gmra.mrb[0].mxu1 %vm124_vm3, %v3995_v23  ;;  %v3348_v23 = vld [vmem:[%s4807_s4 + $0xc] sm:$0xf] }
 0x123   :  { %3732 = vmatpush3.bf16.msra.mxu1 %v778_v9  ;;  %3735 = vmatprep.mubr.msk.bf16.mxu1 %vm4117_vm2, %v4116_v24 }
 0x124   :  { %3733 = vmatprep.subr.bf16.mxu1 %v4116_v24 }
 0x127   :  { %3734 = vmatpush3.bf16.msra.mxu1 %v779_v7 }
 0x128   :  { %3745 = vmatprep.subr.bf16.mxu1 %v4116_v24 }
 0x12e   :  { %3736 = vmatmul.mubr.msk.bf16.vlgmr.msra.gmra.mrb[0].mxu1 %vm124_vm3, %v3996_v26 }
 0x12f   :  { %3746 = vmatpush3.bf16.msra.mxu1 %v888_v16  ;;  %3749 = vmatprep.mubr.msk.bf16.mxu1 %vm4117_vm2, %v4116_v24 }
 0x130   :  { %3747 = vmatprep.subr.bf16.mxu1 %v4116_v24 }
 0x133   :  { %3748 = vmatpush3.bf16.msra.mxu1 %v889_v14 }
 0x134   :  { %3759 = vmatprep.subr.bf16.mxu1 %v4116_v24 }
 0x13a   :  { %3750 = vmatmul.mubr.msk.bf16.vlgmr.msra.gmra.mrb[0].mxu1 %vm124_vm3, %v3997_v27 }
 0x13b   :  { %3760 = vmatpush3.bf16.msra.mxu1 %v998_v22  ;;  %3763 = vmatprep.mubr.msk.bf16.mxu1 %vm4117_vm2, %v4116_v24 }
 0x13c   :  { %3761 = vmatprep.subr.bf16.mxu1 %v4116_v24 }
 0x13f   :  { %3762 = vmatpush3.bf16.msra.mxu1 %v999_v20 }
 0x140   :  { %3773 = vmatprep.subr.bf16.mxu1 %v4116_v24 }
 0x146   :  { %3764 = vmatmul.mubr.msk.bf16.vlgmr.msra.gmra.mrb[0].mxu1 %vm124_vm3, %v3998_v28 }
 0x147   :  { %3775 = vmatprep.mubr.msk.bf16.mxu1 %vm4117_vm2, %v4116_v24 }
 0x219   :  { %v1042_v31 = vpop.f32.mrb[0].mxu1 }
 0x21a   :  { %v3875_v32 = vadd.f32 %v1042_v31, %v47_v30  ;;  %v3765_v33 = vpop.f32.mrb[1].mxu1 }
 0x21b   :  { %v1045_v35 = vpop.f32.mrb[2].mxu1 }
 0x21c   :  { %v3876_v36 = vadd.f32 %v1045_v35, %v52_v34  ;;  %v3766_v37 = vpop.f32.mrb[3].mxu1  ;;  %v1051_v38 = vmax.f32 %v3875_v32, 0.0  ;;  %v3354_v34 = vld [vmem:[%s4807_s4 + $0x10] sm:$0xf] }
 0x21e   :  { %v1052_v39 = vmax.f32 %v3876_v36, 0.0 }
 0x220   :  { %v1053_v41 = vpack.c.bf16 %v1052_v39, %v1051_v38 }
 0x222   :  { %3770 = vmatmul.mubr.msk.bf16.vlgmr.msra.gmra.mrb[36].mxu0 %vm1068_vm4, %v1053_v41 }
 0x223   :  { %3780 = vmatpush3.bf16.msra.mxu0 %v4000_v40  ;;  %3781 = vmatprep.mubr.msk.bf16.mxu0 %vm4117_vm2, %v4116_v24 }
 0x224   :  { %3791 = vmatprep.subr.bf16.mxu0 %v4116_v24 }
 0x22a   :  { %3782 = vmatmul.mubr.msk.bf16.vlgmr.msra.gmra.mrb[40].mxu0 %vm1068_vm4, %v1053_v41 }
 0x22b   :  { %3792 = vmatpush3.bf16.msra.mxu0 %v4001_v42  ;;  %3793 = vmatprep.mubr.msk.bf16.mxu0 %vm4117_vm2, %v4116_v24  ;;  %v3360_v42 = vld [vmem:[%s4807_s4 + $0x14] sm:$0xf] }
 0x22c   :  { %3803 = vmatprep.subr.bf16.mxu0 %v4116_v24 }
 0x232   :  { %3794 = vmatmul.mubr.msk.bf16.vlgmr.msra.gmra.mrb[44].mxu0 %vm1068_vm4, %v1053_v41 }
 0x233   :  { %3804 = vmatpush3.bf16.msra.mxu0 %v4002_v43  ;;  %3805 = vmatprep.mubr.msk.bf16.mxu0 %vm4117_vm2, %v4116_v24 }
 0x234   :  { %3815 = vmatprep.subr.bf16.mxu0 %v4116_v24 }
 0x23a   :  { %3806 = vmatmul.mubr.msk.bf16.vlgmr.msra.gmra.mrb[48].mxu0 %vm1068_vm4, %v1053_v41 }
 0x23b   :  { %3816 = vmatpush3.bf16.msra.mxu0 %v4003_v44  ;;  %3817 = vmatprep.mubr.msk.bf16.mxu0 %vm4117_vm2, %v4116_v24 }
 0x23c   :  { %3827 = vmatprep.subr.bf16.mxu0 %v4116_v24 }
 0x242   :  { %3818 = vmatmul.mubr.msk.bf16.vlgmr.msra.gmra.mrb[52].mxu0 %vm1068_vm4, %v1053_v41 }
 0x243   :  { %3828 = vmatpush3.bf16.msra.mxu0 %v4004_v45  ;;  %3829 = vmatprep.mubr.msk.bf16.mxu0 %vm4117_vm2, %v4116_v24 }
 0x244   :  { %3839 = vmatprep.subr.bf16.mxu0 %v4116_v24 }
 0x24a   :  { %3830 = vmatmul.mubr.msk.bf16.vlgmr.msra.gmra.mrb[56].mxu0 %vm1068_vm4, %v1053_v41 }
 0x24b   :  { %3840 = vmatpush3.bf16.msra.mxu0 %v4005_v46  ;;  %3841 = vmatprep.mubr.msk.bf16.mxu0 %vm4117_vm2, %v4116_v24  ;;  %v3366_v46 = vld [vmem:[%s4807_s4 + $0x18] sm:$0xf] }
 0x24c   :  { %3851 = vmatprep.subr.bf16.mxu0 %v4116_v24 }
 0x252   :  { %3842 = vmatmul.mubr.msk.bf16.vlgmr.msra.gmra.mrb[60].mxu0 %vm1068_vm4, %v1053_v41 }
 0x253   :  { %3852 = vmatpush3.bf16.msra.mxu0 %v4006_v47  ;;  %3853 = vmatprep.mubr.msk.bf16.mxu0 %vm4117_vm2, %v4116_v24  ;;  %v3372_v47 = vld [vmem:[%s4807_s4 + $0x1c] sm:$0xf] }
 0x254   :  { %3863 = vmatprep.subr.bf16.mxu0 %v4116_v24 }
 0x25a   :  { %3854 = vmatmul.mubr.msk.bf16.vlgmr.msra.gmra.mrb[64].mxu0 %vm1068_vm4, %v1053_v41 }
 0x25b   :  { %3864 = vmatpush3.bf16.msra.mxu0 %v4007_v48  ;;  %3865 = vmatprep.mubr.msk.bf16.mxu0 %vm4117_vm2, %v4116_v24  ;;  %v3378_v48 = vld [vmem:[%s4807_s4 + $0x20] sm:$0xf] }
 0x25c   :  { %1995 = vmatprep.subr.bf16.mxu0 %v4010_v51  ;;  %v1058_v51 = vpop.permute.xlu1 %1057 }
 0x262   :  { %3866 = vmatmul.mubr.msk.bf16.vlgmr.msra.gmra.mrb[68].mxu0 %vm1068_vm4, %v1053_v41 }
 0x263   :  { %2027 = vmatprep.mubr.bf16.mxu0 %v4118_v25  ;;  %1996 = vmatpush1.bf16.msra.mxu0 %v4008_v50  ;;  %v4017_v50 = vld [vmem:[%s4806_s9 + $0x30] ss:$8 sps:$4 sm:$0xff]  }
 0x264   :  { %1997 = vmatprep.subr.bf16.mxu0 %v4013_v53 }
 0x267   :  { %1998 = vmatpush1.bf16.msra.mxu0 %v4011_v54 }
 0x268   :  { %1999 = vmatprep.subr.bf16.mxu0 %v4016_v55 }
 0x26b   :  { %2000 = vmatpush1.bf16.msra.mxu0 %v4014_v56 }
 0x26c   :  { %2001 = vmatprep.subr.bf16.mxu0 %v4019_v49  ;;  %v4094_v49 = vld [vmem:[%s4806_s9 + $0x44] ss:$8 sps:$4 sm:$0xff]  }
 0x26f   :  { %2002 = vmatpush1.bf16.msra.mxu0 %v4017_v50 }
 0x2f5   :  { %v1106_v57 = vpop.f32.mrb[36].mxu0 }
 0x2f6   :  { %v3771_v58 = vpop.f32.mrb[37].mxu0 }
 0x2f7   :  { %v1109_v59 = vpop.f32.mrb[38].mxu0  ;;  %v4020_v58 = vld [vmem:[%s4806_s9 + $0x80] ss:$8 sps:$4 sm:$0xff]  }
 0x2f8   :  { %v1114_v60 = vpack.c.bf16 %v1109_v59, %v1106_v57  ;;  %v3772_v61 = vpop.f32.mrb[39].mxu0 }
 0x2f9   :  { %v4023_v61 = vld [vmem:[%s4806_s9 + $0x90] ss:$8 sps:$4 sm:$0xff]  }
 0x2fa   :  { %3774 = vmatpush3.bf16.msra.mxu1 %v1114_v60  ;;  %v4025_v60 = vld [vmem:[%s4806_s9 + $0x94] ss:$8 sps:$4 sm:$0xff]  }
 0x2fb   :  { %3785 = vmatprep.subr.bf16.mxu1 %v4116_v24 }
 0x2fd   :  { %3776 = vmatmul.mubr.msk.bf16.vlgmr.msra.gmra.mrb[4].mxu1 %vm1068_vm4, %v1113_v62  ;;  %v1202_v63 = vpop.f32.mrb[40].mxu0  ;;  %v4028_v62 = vld [vmem:[%s4806_s9 + $0xa4] ss:$8 sps:$4 sm:$0xff]  }
 0x2fe   :  { %v3783_v0 = vpop.f32.mrb[41].mxu0  ;;  %3787 = vmatprep.mubr.msk.bf16.mxu1 %vm4117_vm2, %v4116_v24 }
 0x2ff   :  { %v1205_v1 = vpop.f32.mrb[42].mxu0  ;;  %v4031_v0 = vld [vmem:[%s4806_s9 + $0xb4] ss:$8 sps:$4 sm:$0xff]  }
 0x300   :  { %v1211_v2 = vpack.c.bf16 %v1205_v1, %v1202_v63  ;;  %v3784_v3 = vpop.f32.mrb[43].mxu0  ;;  %v4026_v63 = vld [vmem:[%s4806_s9 + $0xa0] ss:$8 sps:$4 sm:$0xff]   ;;  %v4029_v1 = vld [vmem:[%s4806_s9 + $0xb0] ss:$8 sps:$4 sm:$0xff]  }
 0x301   :  { %v4032_v3 = vld [vmem:[%s4806_s9 + $0xc0] ss:$8 sps:$4 sm:$0xff]  }
 0x302   :  { %3786 = vmatpush3.bf16.msra.mxu1 %v1211_v2  ;;  %v4034_v2 = vld [vmem:[%s4806_s9 + $0xc4] ss:$8 sps:$4 sm:$0xff]  }
 0x303   :  { %3797 = vmatprep.subr.bf16.mxu1 %v4116_v24 }
 0x305   :  { %v1299_v4 = vpop.f32.mrb[44].mxu0 }
 0x306   :  { %v3795_v5 = vpop.f32.mrb[45].mxu0 }
 0x307   :  { %v1302_v7 = vpop.f32.mrb[46].mxu0  ;;  %v4035_v5 = vld [vmem:[%s4806_s9 + $0xd0] ss:$8 sps:$4 sm:$0xff]  }
 0x308   :  { %v1308_v8 = vpack.c.bf16 %v1302_v7, %v1299_v4  ;;  %v3796_v9 = vpop.f32.mrb[47].mxu0  ;;  %v4037_v4 = vld [vmem:[%s4806_s9 + $0xd4] ss:$8 sps:$4 sm:$0xff]   ;;  %v4038_v7 = vld [vmem:[%s4806_s9 + $0xe0] ss:$8 sps:$4 sm:$0xff]  }
 0x309   :  { %3788 = vmatmul.mubr.msk.bf16.vlgmr.msra.gmra.mrb[4].mxu1 %vm1068_vm4, %v3336_v6  ;;  %v4040_v6 = vld [vmem:[%s4806_s9 + $0xe4] ss:$8 sps:$4 sm:$0xff]   ;;  %v4041_v9 = vld [vmem:[%s4806_s9 + $0xf0] ss:$8 sps:$4 sm:$0xff]  }
 0x30a   :  { %3798 = vmatpush3.bf16.msra.mxu1 %v1308_v8  ;;  %3799 = vmatprep.mubr.msk.bf16.mxu1 %vm4117_vm2, %v4116_v24  ;;  %v4043_v8 = vld [vmem:[%s4806_s9 + $0xf4] ss:$8 sps:$4 sm:$0xff]  }
 0x30b   :  { %3809 = vmatprep.subr.bf16.mxu1 %v4116_v24 }
 0x30d   :  { %v1396_v10 = vpop.f32.mrb[48].mxu0 }
 0x30e   :  { %v3807_v11 = vpop.f32.mrb[49].mxu0 }
 0x30f   :  { %v1399_v12 = vpop.f32.mrb[50].mxu0  ;;  %v4044_v11 = vld [vmem:[%s4806_s9 + $0x100] ss:$8 sps:$4 sm:$0xff]  }
 0x310   :  { %v1405_v13 = vpack.c.bf16 %v1399_v12, %v1396_v10  ;;  %v3808_v14 = vpop.f32.mrb[51].mxu0  ;;  %v4046_v10 = vld [vmem:[%s4806_s9 + $0x104] ss:$8 sps:$4 sm:$0xff]   ;;  %v4049_v12 = vld [vmem:[%s4806_s9 + $0x114] ss:$8 sps:$4 sm:$0xff]  }
 0x311   :  { %v4052_v14 = vld [vmem:[%s4806_s9 + $0x124] ss:$8 sps:$4 sm:$0xff]  }
 0x315   :  { %3800 = vmatmul.mubr.msk.bf16.vlgmr.msra.gmra.mrb[4].mxu1 %vm1068_vm4, %v3342_v15  ;;  %v1493_v16 = vpop.f32.mrb[52].mxu0  ;;  %v4050_v15 = vld [vmem:[%s4806_s9 + $0x120] ss:$8 sps:$4 sm:$0xff]  }
 0x316   :  { %3810 = vmatpush3.bf16.msra.mxu1 %v1405_v13  ;;  %v3819_v17 = vpop.f32.mrb[53].mxu0  ;;  %3811 = vmatprep.mubr.msk.bf16.mxu1 %vm4117_vm2, %v4116_v24  ;;  %v4047_v13 = vld [vmem:[%s4806_s9 + $0x110] ss:$8 sps:$4 sm:$0xff]  }
 0x317   :  { %v1496_v18 = vpop.f32.mrb[54].mxu0  ;;  %3821 = vmatprep.subr.bf16.mxu1 %v4116_v24  ;;  %v4053_v17 = vld [vmem:[%s4806_s9 + $0x130] ss:$8 sps:$4 sm:$0xff]  }
 0x318   :  { %v1502_v19 = vpack.c.bf16 %v1496_v18, %v1493_v16  ;;  %v3820_v20 = vpop.f32.mrb[55].mxu0  ;;  %v4055_v16 = vld [vmem:[%s4806_s9 + $0x134] ss:$8 sps:$4 sm:$0xff]   ;;  %v4058_v18 = vld [vmem:[%s4806_s9 + $0x184] ss:$8 sps:$4 sm:$0xff]  }
 0x319   :  { %v4061_v20 = vld [vmem:[%s4806_s9 + $0x194] ss:$8 sps:$4 sm:$0xff]  }
 0x31d   :  { %v1590_v21 = vpop.f32.mrb[56].mxu0 }
 0x31e   :  { %v3831_v22 = vpop.f32.mrb[57].mxu0 }
 0x31f   :  { %v1593_v26 = vpop.f32.mrb[58].mxu0  ;;  %v4064_v22 = vld [vmem:[%s4806_s9 + $0x1a4] ss:$8 sps:$4 sm:$0xff]  }
 0x320   :  { %v1599_v27 = vpack.c.bf16 %v1593_v26, %v1590_v21  ;;  %v3832_v28 = vpop.f32.mrb[59].mxu0  ;;  %v4059_v21 = vld [vmem:[%s4806_s9 + $0x190] ss:$8 sps:$4 sm:$0xff]   ;;  %v4067_v26 = vld [vmem:[%s4806_s9 + $0x1b4] ss:$8 sps:$4 sm:$0xff]  }
 0x321   :  { %3812 = vmatmul.mubr.msk.bf16.vlgmr.msra.gmra.mrb[4].mxu1 %vm1068_vm4, %v3348_v23  ;;  %v4062_v23 = vld [vmem:[%s4806_s9 + $0x1a0] ss:$8 sps:$4 sm:$0xff]   ;;  %v4070_v28 = vld [vmem:[%s4806_s9 + $0x1c4] ss:$8 sps:$4 sm:$0xff]  }
 0x322   :  { %3822 = vmatpush3.bf16.msra.mxu1 %v1502_v19  ;;  %3823 = vmatprep.mubr.msk.bf16.mxu1 %vm4117_vm2, %v4116_v24  ;;  %v4056_v19 = vld [vmem:[%s4806_s9 + $0x180] ss:$8 sps:$4 sm:$0xff]  }
 0x323   :  { %3833 = vmatprep.subr.bf16.mxu1 %v4116_v24 }
 0x325   :  { %v1687_v29 = vpop.f32.mrb[60].mxu0 }
 0x326   :  { %v3843_v30 = vpop.f32.mrb[61].mxu0 }
 0x327   :  { %v1690_v31 = vpop.f32.mrb[62].mxu0  ;;  %v4073_v30 = vld [vmem:[%s4806_s9 + $0x1d4] ss:$8 sps:$4 sm:$0xff]  }
 0x328   :  { %v1696_v32 = vpack.c.bf16 %v1690_v31, %v1687_v29  ;;  %v3844_v33 = vpop.f32.mrb[63].mxu0  ;;  %v4068_v29 = vld [vmem:[%s4806_s9 + $0x1c0] ss:$8 sps:$4 sm:$0xff]   ;;  %v4071_v31 = vld [vmem:[%s4806_s9 + $0x1d0] ss:$8 sps:$4 sm:$0xff]  }
 0x329   :  { %v4074_v33 = vld [vmem:[%s4806_s9 + $0x1e0] ss:$8 sps:$4 sm:$0xff]  }
 0x32d   :  { %3824 = vmatmul.mubr.msk.bf16.vlgmr.msra.gmra.mrb[4].mxu1 %vm1068_vm4, %v3354_v34  ;;  %v1784_v35 = vpop.f32.mrb[64].mxu0  ;;  %v4079_v34 = vld [vmem:[%s4806_s9 + $0x1f4] ss:$8 sps:$4 sm:$0xff]  }
 0x32e   :  { %3834 = vmatpush3.bf16.msra.mxu1 %v1599_v27  ;;  %v3855_v36 = vpop.f32.mrb[65].mxu0  ;;  %3835 = vmatprep.mubr.msk.bf16.mxu1 %vm4117_vm2, %v4116_v24  ;;  %v4065_v27 = vld [vmem:[%s4806_s9 + $0x1b0] ss:$8 sps:$4 sm:$0xff]  }
 0x32f   :  { %v1787_v37 = vpop.f32.mrb[66].mxu0  ;;  %3845 = vmatprep.subr.bf16.mxu1 %v4116_v24  ;;  %v4082_v36 = vld [vmem:[%s4806_s9 + $0x204] ss:$8 sps:$4 sm:$0xff]  }
 0x330   :  { %v1793_v38 = vpack.c.bf16 %v1787_v37, %v1784_v35  ;;  %v3856_v39 = vpop.f32.mrb[67].mxu0  ;;  %v4077_v35 = vld [vmem:[%s4806_s9 + $0x1f0] ss:$8 sps:$4 sm:$0xff]   ;;  %v4080_v37 = vld [vmem:[%s4806_s9 + $0x200] ss:$8 sps:$4 sm:$0xff]  }
 0x331   :  { %v4083_v39 = vld [vmem:[%s4806_s9 + $0x210] ss:$8 sps:$4 sm:$0xff]  }
 0x335   :  { %v1881_v40 = vpop.f32.mrb[68].mxu0 }
 0x336   :  { %v3867_v41 = vpop.f32.mrb[69].mxu0 }
 0x337   :  { %v1884_v43 = vpop.f32.mrb[70].mxu0  ;;  %v4086_v41 = vld [vmem:[%s4806_s9 + $0x220] ss:$8 sps:$4 sm:$0xff]  }
 0x338   :  { %v1890_v44 = vpack.c.bf16 %v1884_v43, %v1881_v40  ;;  %v3868_v45 = vpop.f32.mrb[71].mxu0  ;;  %v4088_v40 = vld [vmem:[%s4806_s9 + $0x224] ss:$8 sps:$4 sm:$0xff]   ;;  %v4089_v43 = vld [vmem:[%s4806_s9 + $0x230] ss:$8 sps:$4 sm:$0xff]  }
 0x339   :  { %3836 = vmatmul.mubr.msk.bf16.vlgmr.msra.gmra.mrb[4].mxu1 %vm1068_vm4, %v3360_v42  ;;  %v4091_v42 = vld [vmem:[%s4806_s9 + $0x234] ss:$8 sps:$4 sm:$0xff]  }
 0x33a   :  { %3846 = vmatpush3.bf16.msra.mxu1 %v1696_v32  ;;  %3847 = vmatprep.mubr.msk.bf16.mxu1 %vm4117_vm2, %v4116_v24  ;;  %v4076_v32 = vld [vmem:[%s4806_s9 + $0x1e4] ss:$8 sps:$4 sm:$0xff]  }
 0x33b   :  { %3857 = vmatprep.subr.bf16.mxu1 %v4116_v24 }
 0x345   :  { %3848 = vmatmul.mubr.msk.bf16.vlgmr.msra.gmra.mrb[4].mxu1 %vm1068_vm4, %v3366_v46 }
 0x346   :  { %3858 = vmatpush3.bf16.msra.mxu1 %v1793_v38  ;;  %3859 = vmatprep.mubr.msk.bf16.mxu1 %vm4117_vm2, %v4116_v24  ;;  %v4085_v38 = vld [vmem:[%s4806_s9 + $0x214] ss:$8 sps:$4 sm:$0xff]  }
 0x347   :  { %3869 = vmatprep.subr.bf16.mxu1 %v4116_v24 }
 0x351   :  { %3860 = vmatmul.mubr.msk.bf16.vlgmr.msra.gmra.mrb[4].mxu1 %vm1068_vm4, %v3372_v47 }
 0x352   :  { %3870 = vmatpush3.bf16.msra.mxu1 %v1890_v44  ;;  %3871 = vmatprep.mubr.msk.bf16.mxu1 %vm4117_vm2, %v4116_v24  ;;  %v4022_v24 = vld [vmem:[%s4806_s9 + $0x84] ss:$8 sps:$4 sm:$0xff]  }
 0x353   :  { %2288 = vmatprep.subr.bf16.mxu0 %v4022_v24 }
 0x35d   :  { %3872 = vmatmul.mubr.msk.bf16.vlgmr.msra.gmra.mrb[4].mxu1 %vm1068_vm4, %v3378_v48 }
 0x35e   :  { %2082 = vmatprep.mubr.bf16.mxu1 %v4118_v25 }
 0x430   :  { %v1928_v52 = vpop.f32.mrb[4].mxu1 }
 0x431   :  { %v3877_v53 = vadd.f32 %v1928_v52, %v1058_v51  ;;  %v3873_v54 = vpop.f32.mrb[5].mxu1  ;;  %v4092_v51 = vld [vmem:[%s4806_s9 + $0x40] ss:$8 sps:$4 sm:$0xff]  }
 0x432   :  { %v1931_v55 = vpop.f32.mrb[6].mxu1  ;;  %v2036_v52 = vld [vmem:[%s4808_s7] sm:$0x7]  ;;  %v4095_v54 = vld [vmem:[%s4806_s9 + $0x50] ss:$8 sps:$4 sm:$0xff]  }
 0x433   :  { %v1935_v56 = vmax.f32 %v3877_v53, 0.0  ;;  %v3874_v57 = vpop.f32.mrb[7].mxu1  ;;  %v4097_v53 = vld [vmem:[%s4806_s9 + $0x54] ss:$8 sps:$4 sm:$0xff]   ;;  %v4100_v55 = vld [vmem:[%s4806_s9 + $0x64] ss:$8 sps:$4 sm:$0xff]  }
 0x434   :  { %v4103_v57 = vld [vmem:[%s4806_s9 + $0x74] ss:$8 sps:$4 sm:$0xff]  }
 0x435   :  { %v4493_v59 = vpack.c.bf16 %v1935_v56, %v1935_v56  ;;  %v4098_v56 = vld [vmem:[%s4806_s9 + $0x60] ss:$8 sps:$4 sm:$0xff]  }
 0x437   :  { %3388 = vmatmul.mubr.msk.bf16.vlgmr.msra.gmra.mrb[72].mxu0 %vm1991_vm5, %v4493_v59 }
 0x438   :  { %2289 = vmatpush1.bf16.msra.mxu0 %v4020_v58  ;;  %2320 = vmatprep.mubr.bf16.mxu0 %v4118_v25 }
 0x439   :  { %2290 = vmatprep.subr.bf16.mxu0 %v4025_v60 }
 0x43c   :  { %2291 = vmatpush1.bf16.msra.mxu0 %v4023_v61  ;;  %v4101_v61 = vld [vmem:[%s4806_s9 + $0x70] ss:$8 sps:$4 sm:$0xff]  }
 0x43d   :  { %2292 = vmatprep.subr.bf16.mxu0 %v4028_v62 }
 0x440   :  { %2293 = vmatpush1.bf16.msra.mxu0 %v4026_v63 }
 0x441   :  { %2294 = vmatprep.subr.bf16.mxu0 %v4031_v0 }
 0x444   :  { %2295 = vmatpush1.bf16.msra.mxu0 %v4029_v1 }
 0x445   :  { %2434 = vmatprep.subr.bf16.mxu0 %v4034_v2 }
 0x447   :  { %3427 = vmatmul.mubr.msk.bf16.vlgmr.msra.gmra.mrb[76].mxu0 %vm1991_vm5, %v4493_v59 }
 0x448   :  { %2435 = vmatpush1.bf16.msra.mxu0 %v4032_v3  ;;  %2466 = vmatprep.mubr.bf16.mxu0 %v4118_v25 }
 0x449   :  { %2436 = vmatprep.subr.bf16.mxu0 %v4037_v4 }
 0x44c   :  { %2437 = vmatpush1.bf16.msra.mxu0 %v4035_v5 }
 0x44d   :  { %2438 = vmatprep.subr.bf16.mxu0 %v4040_v6 }
 0x450   :  { %2439 = vmatpush1.bf16.msra.mxu0 %v4038_v7 }
 0x451   :  { %2440 = vmatprep.subr.bf16.mxu0 %v4043_v8 }
 0x454   :  { %2441 = vmatpush1.bf16.msra.mxu0 %v4041_v9 }
 0x455   :  { %2580 = vmatprep.subr.bf16.mxu0 %v4046_v10 }
 0x457   :  { %3447 = vmatmul.mubr.msk.bf16.vlgmr.msra.gmra.mrb[80].mxu0 %vm1991_vm5, %v4493_v59 }
 0x458   :  { %2581 = vmatpush1.bf16.msra.mxu0 %v4044_v11  ;;  %2612 = vmatprep.mubr.bf16.mxu0 %v4118_v25 }
 0x459   :  { %2582 = vmatprep.subr.bf16.mxu0 %v4049_v12 }
 0x45c   :  { %2583 = vmatpush1.bf16.msra.mxu0 %v4047_v13 }
 0x45d   :  { %2584 = vmatprep.subr.bf16.mxu0 %v4052_v14 }
 0x460   :  { %2585 = vmatpush1.bf16.msra.mxu0 %v4050_v15 }
 0x461   :  { %2586 = vmatprep.subr.bf16.mxu0 %v4055_v16 }
 0x464   :  { %2587 = vmatpush1.bf16.msra.mxu0 %v4053_v17 }
 0x465   :  { %2872 = vmatprep.subr.bf16.mxu0 %v4058_v18 }
 0x467   :  { %3467 = vmatmul.mubr.msk.bf16.vlgmr.msra.gmra.mrb[84].mxu0 %vm1991_vm5, %v4493_v59 }
 0x468   :  { %2873 = vmatpush1.bf16.msra.mxu0 %v4056_v19  ;;  %2904 = vmatprep.mubr.bf16.mxu0 %v4118_v25 }
 0x469   :  { %2874 = vmatprep.subr.bf16.mxu0 %v4061_v20 }
 0x46c   :  { %2875 = vmatpush1.bf16.msra.mxu0 %v4059_v21 }
 0x46d   :  { %2876 = vmatprep.subr.bf16.mxu0 %v4064_v22 }
 0x470   :  { %2877 = vmatpush1.bf16.msra.mxu0 %v4062_v23 }
 0x471   :  { %2878 = vmatprep.subr.bf16.mxu0 %v4067_v26 }
 0x474   :  { %2879 = vmatpush1.bf16.msra.mxu0 %v4065_v27 }
 0x475   :  { %3018 = vmatprep.subr.bf16.mxu0 %v4070_v28 }
 0x477   :  { %3507 = vmatmul.mubr.msk.bf16.vlgmr.msra.gmra.mrb[88].mxu0 %vm1991_vm5, %v4493_v59 }
 0x478   :  { %3019 = vmatpush1.bf16.msra.mxu0 %v4068_v29  ;;  %3050 = vmatprep.mubr.bf16.mxu0 %v4118_v25 }
 0x479   :  { %3020 = vmatprep.subr.bf16.mxu0 %v4073_v30 }
 0x47c   :  { %3021 = vmatpush1.bf16.msra.mxu0 %v4071_v31  ;;  %v3408_v31 = vld [vmem:[%s4808_s7 + $0x4] sm:$0x7] }
 0x47d   :  { %3022 = vmatprep.subr.bf16.mxu0 %v4076_v32 }
 0x480   :  { %3023 = vmatpush1.bf16.msra.mxu0 %v4074_v33 }
 0x481   :  { %3024 = vmatprep.subr.bf16.mxu0 %v4079_v34 }
 0x484   :  { %3025 = vmatpush1.bf16.msra.mxu0 %v4077_v35  ;;  %v3428_v35 = vld [vmem:[%s4808_s7 + $0x8] sm:$0x7] }
 0x485   :  { %3164 = vmatprep.subr.bf16.mxu0 %v4082_v36 }
 0x487   :  { %3527 = vmatmul.mubr.msk.bf16.vlgmr.msra.gmra.mrb[92].mxu0 %vm1991_vm5, %v4493_v59 }
 0x488   :  { %3165 = vmatpush1.bf16.msra.mxu0 %v4080_v37  ;;  %3196 = vmatprep.mubr.bf16.mxu0 %v4118_v25 }
 0x489   :  { %3166 = vmatprep.subr.bf16.mxu0 %v4085_v38 }
 0x48c   :  { %3167 = vmatpush1.bf16.msra.mxu0 %v4083_v39  ;;  %v3448_v39 = vld [vmem:[%s4808_s7 + $0xc] sm:$0x7] }
 0x48d   :  { %3168 = vmatprep.subr.bf16.mxu0 %v4088_v40  ;;  %v4106_v40 = vld [vmem:[%s4806_s9 + $0x144] ss:$8 sps:$4 sm:$0xff]  }
 0x490   :  { %3169 = vmatpush1.bf16.msra.mxu0 %v4086_v41 }
 0x491   :  { %3170 = vmatprep.subr.bf16.mxu0 %v4091_v42  ;;  %v4104_v42 = vld [vmem:[%s4806_s9 + $0x140] ss:$8 sps:$4 sm:$0xff]  }
 0x494   :  { %3171 = vmatpush1.bf16.msra.mxu0 %v4089_v43  ;;  %v3468_v43 = vld [vmem:[%s4808_s7 + $0x10] sm:$0x7] }
 0x497   :  { %3547 = vmatmul.mubr.msk.bf16.vlgmr.msra.gmra.mrb[96].mxu0 %vm1991_vm5, %v4493_v59 }
 0x50a   :  { %v2029_v44 = vpop.f32.mrb[72].mxu0 }
 0x50b   :  { %v2037_v45 = vpack.c.bf16 %v2029_v44, %v2029_v44  ;;  %v2031_v46 = vpop.f32.mrb[73].mxu0  ;;  %v4109_v44 = vld [vmem:[%s4806_s9 + $0x154] ss:$8 sps:$4 sm:$0xff]  }
 0x50c   :  { %v2038_v47 = vpack.c.bf16 %v2031_v46, %v2031_v46  ;;  %v2033_v48 = vpop.f32.mrb[74].mxu0  ;;  %v4112_v46 = vld [vmem:[%s4806_s9 + $0x164] ss:$8 sps:$4 sm:$0xff]  }
 0x50d   :  { %v2045_v50 = vsel %vm2043_vm6, %v2037_v45, 0  ;;  %v2034_v24 = vpop.f32.mrb[75].mxu0  ;;  %v4107_v45 = vld [vmem:[%s4806_s9 + $0x150] ss:$8 sps:$4 sm:$0xff]   ;;  %v4115_v48 = vld [vmem:[%s4806_s9 + $0x174] ss:$8 sps:$4 sm:$0xff]  }
 0x50e   :  { %3389 = vmatprep.subr.msk.bf16.mxu1 %vm2043_vm6, %v2038_v47  ;;  %v4110_v47 = vld [vmem:[%s4806_s9 + $0x160] ss:$8 sps:$4 sm:$0xff]  }
 0x50f   :  { %2051 = vmatpush1.bf16.msra.mxu1 %v2045_v50 }
 0x510   :  { %2142 = vmatprep.subr.bf16.mxu1 %v4094_v49  ;;  %v4113_v49 = vld [vmem:[%s4806_s9 + $0x170] ss:$8 sps:$4 sm:$0xff]  }
 0x512   :  { %3390 = vmatmul.mubr.msk.bf16.vlgmr.msra.gmra.mrb[8].mxu1 %vm2039_vm7, %v2036_v52 }
 0x513   :  { %2143 = vmatpush1.bf16.msra.mxu1 %v4092_v51  ;;  %2174 = vmatprep.mubr.bf16.mxu1 %v4118_v25 }
 0x514   :  { %2144 = vmatprep.subr.bf16.mxu1 %v4097_v53 }
 0x517   :  { %2145 = vmatpush1.bf16.msra.mxu1 %v4095_v54 }
 0x518   :  { %2146 = vmatprep.subr.bf16.mxu1 %v4100_v55 }
 0x51a   :  { %v2322_v58 = vpop.f32.mrb[76].mxu0 }
 0x51b   :  { %v2324_v60 = vpop.f32.mrb[77].mxu0  ;;  %2147 = vmatpush1.bf16.msra.mxu1 %v4098_v56  ;;  %v2331_v29 = vpack.c.bf16 %v2322_v58, %v2322_v58 }
 0x51c   :  { %v2326_v62 = vpop.f32.mrb[78].mxu0  ;;  %2148 = vmatprep.subr.bf16.mxu1 %v4103_v57  ;;  %v2332_v30 = vpack.c.bf16 %v2324_v60, %v2324_v60 }
 0x51d   :  { %v2327_v63 = vpop.f32.mrb[79].mxu0  ;;  %v2337_v32 = vsel %vm2043_vm6, %v2331_v29, 0  ;;  %v3508_v62 = vld [vmem:[%s4808_s7 + $0x18] sm:$0x7] }
 0x51f   :  { %2149 = vmatpush1.bf16.msra.mxu1 %v4101_v61 }
 0x522   :  { %3407 = vmatmul.mubr.msk.bf16.vlgmr.msra.gmra.mrb[12].mxu1 %vm1991_vm5, %v4493_v59 }
 0x523   :  { %2228 = vmatprep.mubr.bf16.mxu1 %v4118_v25 }
 0x52a   :  { %v2468_v0 = vpop.f32.mrb[80].mxu0 }
 0x52b   :  { %v2470_v1 = vpop.f32.mrb[81].mxu0  ;;  %v2477_v34 = vpack.c.bf16 %v2468_v0, %v2468_v0 }
 0x52c   :  { %v2472_v2 = vpop.f32.mrb[82].mxu0  ;;  %v2478_v33 = vpack.c.bf16 %v2470_v1, %v2470_v1 }
 0x52d   :  { %v2473_v3 = vpop.f32.mrb[83].mxu0  ;;  %v2483_v36 = vsel %vm2043_vm6, %v2477_v34, 0  ;;  %v3528_v2 = vld [vmem:[%s4808_s7 + $0x1c] sm:$0x7] }
 0x53a   :  { %v2614_v4 = vpop.f32.mrb[84].mxu0 }
 0x53b   :  { %v2616_v5 = vpop.f32.mrb[85].mxu0  ;;  %v2623_v38 = vpack.c.bf16 %v2614_v4, %v2614_v4  ;;  %v3548_v4 = vld [vmem:[%s4808_s7 + $0x20] sm:$0x7] }
 0x53c   :  { %v2618_v6 = vpop.f32.mrb[86].mxu0  ;;  %v2624_v37 = vpack.c.bf16 %v2616_v5, %v2616_v5  ;;  %v1941_v5 = vpop.permute.xlu1 %1940 }
 0x53d   :  { %v2619_v7 = vpop.f32.mrb[87].mxu0  ;;  %v2629_v41 = vsel %vm2043_vm6, %v2623_v38, 0 }
 0x54a   :  { %v4687_v8 = vpop.f32.mrb[88].mxu0 }
 0x54b   :  { %v4689_v9 = vpop.f32.mrb[89].mxu0  ;;  %v2915_v56 = vpack.c.bf16 %v4687_v8, %v4687_v8 }
 0x54c   :  { %v2910_v10 = vpop.f32.mrb[90].mxu0  ;;  %v2916_v57 = vpack.c.bf16 %v4689_v9, %v4689_v9 }
 0x54d   :  { %v2911_v11 = vpop.f32.mrb[91].mxu0  ;;  %v2921_v58 = vsel %vm2043_vm6, %v2915_v56, 0 }
 0x55a   :  { %v4691_v12 = vpop.f32.mrb[92].mxu0 }
 0x55b   :  { %v4693_v13 = vpop.f32.mrb[93].mxu0  ;;  %v3061_v61 = vpack.c.bf16 %v4691_v12, %v4691_v12 }
 0x55c   :  { %v3056_v14 = vpop.f32.mrb[94].mxu0  ;;  %v3062_v60 = vpack.c.bf16 %v4693_v13, %v4693_v13 }
 0x55d   :  { %v3057_v15 = vpop.f32.mrb[95].mxu0  ;;  %v3067_v63 = vsel %vm2043_vm6, %v3061_v61, 0 }
 0x56a   :  { %v4695_v16 = vpop.f32.mrb[96].mxu0 }
 0x56b   :  { %v4697_v17 = vpop.f32.mrb[97].mxu0  ;;  %v3207_v1 = vpack.c.bf16 %v4695_v16, %v4695_v16 }
 0x56c   :  { %v3202_v18 = vpop.f32.mrb[98].mxu0  ;;  %v3208_v0 = vpack.c.bf16 %v4697_v17, %v4697_v17 }
 0x56d   :  { %v3203_v19 = vpop.f32.mrb[99].mxu0  ;;  %v3213_v3 = vsel %vm2043_vm6, %v3207_v1, 0 }
 0x5f5   :  { %v2176_v20 = vpop.f32.mrb[12].mxu1 }
 0x5f6   :  { %v2185_v21 = vpack.c.bf16 %v2176_v20, %v2176_v20  ;;  %v2178_v22 = vpop.f32.mrb[13].mxu1 }
 0x5f7   :  { %v2186_v23 = vpack.c.bf16 %v2178_v22, %v2178_v22  ;;  %v2180_v26 = vpop.f32.mrb[14].mxu1 }
 0x5f8   :  { %v2191_v27 = vsel %vm2043_vm6, %v2185_v21, 0  ;;  %v2181_v28 = vpop.f32.mrb[15].mxu1 }
 0x5f9   :  { %3409 = vmatprep.subr.msk.bf16.mxu1 %vm2043_vm6, %v2186_v23 }
 0x5fa   :  { %2197 = vmatpush1.bf16.msra.mxu1 %v2191_v27 }
 0x5fb   :  { %3429 = vmatprep.subr.msk.bf16.mxu1 %vm2043_vm6, %v2332_v30 }
 0x5fd   :  { %3410 = vmatmul.mubr.msk.bf16.vlgmr.msra.gmra.mrb[8].mxu1 %vm2039_vm7, %v3408_v31 }
 0x5fe   :  { %2343 = vmatpush1.bf16.msra.mxu1 %v2337_v32  ;;  %2374 = vmatprep.mubr.bf16.mxu1 %v4118_v25 }
 0x5ff   :  { %3449 = vmatprep.subr.msk.bf16.mxu1 %vm2043_vm6, %v2478_v33 }
 0x609   :  { %3430 = vmatmul.mubr.msk.bf16.vlgmr.msra.gmra.mrb[8].mxu1 %vm2039_vm7, %v3428_v35 }
 0x60a   :  { %2489 = vmatpush1.bf16.msra.mxu1 %v2483_v36  ;;  %2520 = vmatprep.mubr.bf16.mxu1 %v4118_v25 }
 0x60b   :  { %3469 = vmatprep.subr.msk.bf16.mxu1 %vm2043_vm6, %v2624_v37 }
 0x615   :  { %3450 = vmatmul.mubr.msk.bf16.vlgmr.msra.gmra.mrb[8].mxu1 %vm2039_vm7, %v3448_v39 }
 0x616   :  { %2635 = vmatpush1.bf16.msra.mxu1 %v2629_v41  ;;  %2666 = vmatprep.mubr.bf16.mxu1 %v4118_v25 }
 0x617   :  { %2726 = vmatprep.subr.bf16.mxu1 %v4106_v40 }
 0x621   :  { %3470 = vmatmul.mubr.msk.bf16.vlgmr.msra.gmra.mrb[8].mxu1 %vm2039_vm7, %v3468_v43 }
 0x622   :  { %2727 = vmatpush1.bf16.msra.mxu1 %v4104_v42  ;;  %2758 = vmatprep.mubr.bf16.mxu1 %v4118_v25 }
 0x623   :  { %2728 = vmatprep.subr.bf16.mxu1 %v4109_v44 }
 0x626   :  { %2729 = vmatpush1.bf16.msra.mxu1 %v4107_v45 }
 0x627   :  { %2730 = vmatprep.subr.bf16.mxu1 %v4112_v46 }
 0x62a   :  { %2731 = vmatpush1.bf16.msra.mxu1 %v4110_v47 }
 0x62b   :  { %2732 = vmatprep.subr.bf16.mxu1 %v4115_v48 }
 0x62e   :  { %2733 = vmatpush1.bf16.msra.mxu1 %v4113_v49 }
 0x631   :  { %3487 = vmatmul.mubr.msk.bf16.vlgmr.msra.gmra.mrb[16].mxu1 %vm1991_vm5, %v4493_v59  ;;  %v3488_v59 = vld [vmem:[%s4808_s7 + $0x14] sm:$0x7] }
 0x632   :  { %2812 = vmatprep.mubr.bf16.mxu1 %v4118_v25 }
 0x704   :  { %v2760_v50 = vpop.f32.mrb[16].mxu1 }
 0x705   :  { %v2769_v24 = vpack.c.bf16 %v2760_v50, %v2760_v50  ;;  %v2762_v51 = vpop.f32.mrb[17].mxu1 }
 0x706   :  { %v2770_v52 = vpack.c.bf16 %v2762_v51, %v2762_v51  ;;  %v2764_v53 = vpop.f32.mrb[18].mxu1 }
 0x707   :  { %v2775_v54 = vsel %vm2043_vm6, %v2769_v24, 0  ;;  %v2765_v55 = vpop.f32.mrb[19].mxu1 }
 0x708   :  { %3489 = vmatprep.subr.msk.bf16.mxu1 %vm2043_vm6, %v2770_v52 }
 0x709   :  { %2781 = vmatpush1.bf16.msra.mxu1 %v2775_v54 }
 0x70a   :  { %3509 = vmatprep.subr.msk.bf16.mxu1 %vm2043_vm6, %v2916_v57 }
 0x70c   :  { %3490 = vmatmul.mubr.msk.bf16.vlgmr.msra.gmra.mrb[8].mxu1 %vm2039_vm7, %v3488_v59 }
 0x70d   :  { %2927 = vmatpush1.bf16.msra.mxu1 %v2921_v58  ;;  %2958 = vmatprep.mubr.bf16.mxu1 %v4118_v25 }
 0x70e   :  { %3529 = vmatprep.subr.msk.bf16.mxu1 %vm2043_vm6, %v3062_v60 }
 0x718   :  { %3510 = vmatmul.mubr.msk.bf16.vlgmr.msra.gmra.mrb[8].mxu1 %vm2039_vm7, %v3508_v62 }
 0x719   :  { %3073 = vmatpush1.bf16.msra.mxu1 %v3067_v63  ;;  %3104 = vmatprep.mubr.bf16.mxu1 %v4118_v25 }
 0x71a   :  { %3549 = vmatprep.subr.msk.bf16.mxu1 %vm2043_vm6, %v3208_v0 }
 0x724   :  { %3530 = vmatmul.mubr.msk.bf16.vlgmr.msra.gmra.mrb[8].mxu1 %vm2039_vm7, %v3528_v2 }
 0x725   :  { %3219 = vmatpush1.bf16.msra.mxu1 %v3213_v3  ;;  %3250 = vmatprep.mubr.bf16.mxu1 %v4118_v25 }
 0x730   :  { %3550 = vmatmul.mubr.msk.bf16.vlgmr.msra.gmra.mrb[8].mxu1 %vm2039_vm7, %v3548_v4 }
 0x803   :  { %v3252_v6 = vpop.f32.mrb[8].mxu1 }
 0x804   :  { %v3878_v7 = vadd.f32 %v3252_v6, %v1941_v5  ;;  %v3254_v8 = vpop.f32.mrb[9].mxu1 }
 0x805   :  { %v3879_v9 = vadd.f32 %v3254_v8, %v1941_v5  ;;  %v3256_v10 = vpop.f32.mrb[10].mxu1 }
 0x806   :  { %v3261_v11 = vmax.f32 %v3878_v7, 0.0  ;;  %v3257_v12 = vpop.f32.mrb[11].mxu1 }
 0x807   :  { %v3262_v13 = vmax.f32 %v3879_v9, 0.0 }
 0x808   :  { %3263 = vst [vmem:[%s4809_s10] sm:$0x3f] %v3261_v11 }
 0x809   :  { %3264 = vst [vmem:[%s4809_s10 + $0x8] sm:$0x3f] %v3262_v13 }

</bundles_post_ra>
